<compile_context>
chip_gen: v6e
topology: v6e:2x2x1
jax: 0.10.0
libtpu: 0.0.40
codegen_flags: <defaults>
</compile_context>

<pallas_src>
import jax
import jax.numpy as jnp
from jax.experimental import pallas as pl
from jax.experimental.pallas import tpu as pltpu

WEIGHT_TYING = False  # TODO(synk): weight-tying branch (FF1 @ emb.T) not implemented; requires E == H.
POINTER = True

_LANE = 128
_SUBLANE = 8
_NEG_INF_PAD = -1e30  # bias value for padded vocab columns -> exp() underflows to 0


def _round_up(x, m):
    return ((x + m - 1) // m) * m


def _choose_vocab_tile(vocab_size):
    """Vocab tile width (multiple of 128) and padded vocab size."""
    v128 = _round_up(vocab_size, _LANE)
    tv = min(512, v128)
    v_pad = _round_up(vocab_size, tv)
    return tv, v_pad


# -----------------------------------------------------------------------------
# Kernel
# -----------------------------------------------------------------------------
def _decoder_step_kernel(
    # scalar prefetch (SMEM)
    ids_ref,                                   # (B,) int32 token ids
    # inputs
    emb_hbm,                                   # (V, E) f32, stays in HBM (pl.ANY)
    h0_ref, c0_ref,                            # (B, H) f32
    ctx_ref,                                   # (B, 2H) f32
    wih_ref, whh_ref, bg_ref,                  # (4,E,H) (4,H,H) (4,1,H) f32
    w1h_ref, w1c_ref, b1_ref,                  # (H,H) (2H,H) (1,H) f32
    w2_ref, b2_ref,                            # (H,TV) bf16 tile, (1,TV) f32 tile
    wg_ctx_ref, wg_h_ref, wg_c_ref, wg_e_ref,  # (1,2H) (1,H) (1,H) (1,E) f32
    bgen_ref,                                  # (1,1) f32
    # outputs
    pvocab_ref,                                # (n_tiles, B, TV) f32, VMEM resident
    ht_ref, ct_ref,                            # (B, H) f32
    pgen_ref,                                  # (B, 128) f32 (lane-dense)
    # scratch
    emb_buf,                                   # VMEM (B, E) f32
    ff1_buf,                                   # VMEM (B, H) bf16
    m_buf,                                     # VMEM (B, 1) f32 running max
    dma_sems,                                  # DMA sems (B,)
):
    j = pl.program_id(0)
    n_tiles = pl.num_programs(0)
    B = h0_ref.shape[0]

    # ------------------------------------------------------------------
    # First vocab tile: gather embeddings, run the LSTM step, FF1, p_gen.
    # ------------------------------------------------------------------
    @pl.when(j == 0)
    def _first_tile():
        # Gather the B embedding rows straight from HBM (data-dependent DMA).
        copies = []
        for b in range(B):
            row = ids_ref[b]
            cp = pltpu.make_async_copy(
                emb_hbm.at[pl.ds(row, 1), :],
                emb_buf.at[pl.ds(b, 1), :],
                dma_sems.at[b],
            )
            cp.start()
            copies.append(cp)
        for cp in copies:
            cp.wait()

        emb = emb_buf[...]                                   # (B, E) f32
        h0 = h0_ref[...]
        c0 = c0_ref[...]
        ctx = ctx_ref[...]

        # Single-step LSTM, PyTorch gate order (i, f, g, o). Per-gate weight
        # blocks keep every slice aligned regardless of H.
        def gate(g):
            return (jnp.dot(emb, wih_ref[g], preferred_element_type=jnp.float32)
                    + jnp.dot(h0, whh_ref[g], preferred_element_type=jnp.float32)
                    + bg_ref[g])                             # folded b_ih + b_hh

        i_g = jax.nn.sigmoid(gate(0))
        f_g = jax.nn.sigmoid(gate(1))
        g_g = jnp.tanh(gate(2))
        o_g = jax.nn.sigmoid(gate(3))
        c_t = f_g * c0 + i_g * g_g
        h_t = o_g * jnp.tanh(c_t)

        # FF1 over concat([h_t, context]) as two aligned matmuls.
        ff1 = (jnp.dot(h_t, w1h_ref[...], preferred_element_type=jnp.float32)
               + jnp.dot(ctx, w1c_ref[...], preferred_element_type=jnp.float32)
               + b1_ref[...])
        ff1_buf[...] = ff1.astype(jnp.bfloat16)

        ht_ref[...] = h_t
        ct_ref[...] = c_t

        # Pointer gate: VPU multiply + lane reduction (no N=1 MXU matmuls).
        logit = (jnp.sum(ctx * wg_ctx_ref[...], axis=1, keepdims=True)
                 + jnp.sum(h_t * wg_h_ref[...], axis=1, keepdims=True)
                 + jnp.sum(c_t * wg_c_ref[...], axis=1, keepdims=True)
                 + jnp.sum(emb * wg_e_ref[...], axis=1, keepdims=True)
                 + bgen_ref[...])                            # (B, 1)
        pgen_ref[...] = jnp.broadcast_to(jax.nn.sigmoid(logit), pgen_ref.shape)

        m_buf[...] = jnp.full(m_buf.shape, -jnp.inf, dtype=jnp.float32)

    # ------------------------------------------------------------------
    # Every tile: FF2 logits for this vocab slab (bf16 x bf16 -> f32 MXU),
    # stash in the resident output, track the running max.
    # ------------------------------------------------------------------
    logits = (jnp.dot(ff1_buf[...], w2_ref[...],
                      preferred_element_type=jnp.float32)
              + b2_ref[...])                                 # (B, TV)
    pvocab_ref[j] = logits
    m_buf[...] = jnp.maximum(m_buf[...],
                             jnp.max(logits, axis=1, keepdims=True))

    # ------------------------------------------------------------------
    # Last tile: normalize the resident logits slab into a softmax.
    # ------------------------------------------------------------------
    @pl.when(j == n_tiles - 1)
    def _finalize():
        x = pvocab_ref[...]                                  # (n_tiles, B, TV)
        e = jnp.exp(x - m_buf[...][None, :, :])
        s_lane = jnp.sum(e, axis=2, keepdims=True)           # (n_tiles, B, 1)
        denom = jnp.sum(s_lane, axis=0, keepdims=True)       # (1, B, 1)
        pvocab_ref[...] = e * pl.reciprocal(denom, approx=True)


# -----------------------------------------------------------------------------
# Wrapper
# -----------------------------------------------------------------------------
@jax.jit
def decoder_forward(params, decoder_input, decoder_states, encoder_output,
                    context_vector):
    """Pallas equivalent of Decoder.forward (single decode step).

    decoder_input:  (B,)   int
    decoder_states: tuple of (1, B, H) float32
    encoder_output: (B, S, 2H) float32  (unused by the reference forward)
    context_vector: (B, 2H) float32
    """
    del encoder_output  # not used by the reference Decoder.forward
    # TODO(synk): amortize W2 streaming across decode steps by running T steps
    # per pallas_call (step as an extra grid axis, h/c carried in VMEM scratch).

    h0 = decoder_states[0][0].astype(jnp.float32)            # (B, H)
    c0 = decoder_states[1][0].astype(jnp.float32)            # (B, H)
    ctx = context_vector.astype(jnp.float32)                 # (B, 2H)

    B = decoder_input.shape[0]
    V, E = params["embedding"].shape
    H = h0.shape[1]
    TV, V_pad = _choose_vocab_tile(V)
    n_tiles = V_pad // TV
    B_pad = _round_up(max(B, _SUBLANE), _SUBLANE)

    # Pad batch to a full sublane; clamp ids so the HBM row gather stays in range.
    ids = jnp.clip(decoder_input.astype(jnp.int32), 0, V - 1)
    ids = jnp.pad(ids, (0, B_pad - B))
    pad_b = ((0, B_pad - B), (0, 0))
    h0p = jnp.pad(h0, pad_b)
    c0p = jnp.pad(c0, pad_b)
    ctxp = jnp.pad(ctx, pad_b)

    def _const(shape):
        nd = len(shape)
        return pl.BlockSpec(shape, lambda j, ids_ref, nd=nd: (0,) * nd)

    in_specs = [
        pl.BlockSpec(memory_space=pl.ANY),                        # embedding (HBM)
        _const((B_pad, H)), _const((B_pad, H)), _const((B_pad, 2 * H)),
        _const((4, E, H)), _const((4, H, H)), _const((4, 1, H)),
        _const((H, H)), _const((2 * H, H)), _const((1, H)),
        pl.BlockSpec((H, TV), lambda j, ids_ref: (0, j)),         # W2 vocab tile
        pl.BlockSpec((1, TV), lambda j, ids_ref: (0, j)),         # b2 vocab tile
        _const((1, 2 * H)), _const((1, H)), _const((1, H)), _const((1, E)),
        _const((1, 1)),                                           # b_gen
    ]

    out_shapes = (
        jax.ShapeDtypeStruct((n_tiles, B_pad, TV), jnp.float32),  # p_vocab slabs
        jax.ShapeDtypeStruct((B_pad, H), jnp.float32),            # h_t
        jax.ShapeDtypeStruct((B_pad, H), jnp.float32),            # c_t
        jax.ShapeDtypeStruct((B_pad, _LANE), jnp.float32),        # p_gen (lane-dense)
    )
    out_specs = [
        _const((n_tiles, B_pad, TV)),
        _const((B_pad, H)), _const((B_pad, H)), _const((B_pad, _LANE)),
    ]

    scratch_shapes = [
        pltpu.VMEM((B_pad, E), jnp.float32),       # gathered embeddings
        pltpu.VMEM((B_pad, H), jnp.bfloat16),      # FF1 activations
        pltpu.VMEM((B_pad, 1), jnp.float32),       # running softmax max
        pltpu.SemaphoreType.DMA((B_pad,)),
    ]

    # VMEM budget from actual buffer sizes (inputs double-buffered by BlockSpec).
    def _nbytes(a):
        return int(a.size) * a.dtype.itemsize

    resident = [h0p, c0p, ctxp, params["w_ih"], params["w_hh"], params["b_gates"],
                params["w1_h"], params["w1_c"], params["b1"],
                params["wg_ctx"], params["wg_h"], params["wg_c"], params["wg_e"],
                params["b_gen"]]
    est = (2 * sum(_nbytes(a) for a in resident)
           + 2 * (H * TV * 2 + TV * 4)                                  # W2/b2 tiles
           + 2 * (B_pad * V_pad * 4 + 2 * B_pad * H * 4 + B_pad * _LANE * 4)  # outputs
           + B_pad * E * 4 + B_pad * H * 2 + B_pad * 4)                 # scratch
    vmem_limit = int(min(100 * 2 ** 20, max(32 * 2 ** 20, est + (4 << 20))))

    pvocab_slabs, h_t, c_t, pgen_pad = pl.pallas_call(
        _decoder_step_kernel,
        out_shape=out_shapes,
        grid_spec=pltpu.PrefetchScalarGridSpec(
            num_scalar_prefetch=1,
            grid=(n_tiles,),
            in_specs=in_specs,
            out_specs=out_specs,
            scratch_shapes=scratch_shapes,
        ),
        compiler_params=pltpu.CompilerParams(
            dimension_semantics=("arbitrary",),   # vocab axis carries scratch state
            vmem_limit_bytes=vmem_limit,
        ),
    )(ids, params["embedding"], h0p, c0p, ctxp,
      params["w_ih"], params["w_hh"], params["b_gates"],
      params["w1_h"], params["w1_c"], params["b1"],
      params["w2"], params["b2"],
      params["wg_ctx"], params["wg_h"], params["wg_c"], params["wg_e"],
      params["b_gen"])

    # (n_tiles, B_pad, TV) -> (B_pad, V_pad) -> (B, V)
    p_vocab = jnp.transpose(pvocab_slabs, (1, 0, 2)).reshape(B_pad, V_pad)[:B, :V]
    p_gen = pgen_pad[:B, :1]
    decoder_states_out = (h_t[:B][None, :, :], c_t[:B][None, :, :])
    return p_vocab, decoder_states_out, p_gen


# -----------------------------------------------------------------------------
# Parameters (PyTorch layout) + kernel-layout preparation
# -----------------------------------------------------------------------------
def init_params(key, vocab_size, embed_size, hidden_size):
    """Parameters in the PyTorch module's native layouts."""
    ks = jax.random.split(key, 10)
    s = 0.1
    V, E, H = vocab_size, embed_size, hidden_size
    return {
        "embedding": jax.random.normal(ks[0], (V, E), jnp.float32) * s,
        "lstm_w_ih": jax.random.normal(ks[1], (4 * H, E), jnp.float32) * s,
        "lstm_w_hh": jax.random.normal(ks[2], (4 * H, H), jnp.float32) * s,
        "lstm_b_ih": jax.random.normal(ks[3], (4 * H,), jnp.float32) * s,
        "lstm_b_hh": jax.random.normal(ks[4], (4 * H,), jnp.float32) * s,
        "w1": jax.random.normal(ks[5], (H, 3 * H), jnp.float32) * s,   # (out, in)
        "b1": jax.random.normal(ks[6], (H,), jnp.float32) * s,
        "w2": jax.random.normal(ks[7], (V, H), jnp.float32) * s,       # (out, in)
        "b2": jax.random.normal(ks[8], (V,), jnp.float32) * s,
        "w_gen": jax.random.normal(ks[9], (1, 4 * H + E), jnp.float32) * s,
        "b_gen": jnp.zeros((1,), jnp.float32),
    }


def prepare_params(p):
    """One-time conversion to kernel-friendly layouts (done outside the decode loop)."""
    V, E = p["embedding"].shape
    H = p["w1"].shape[0]
    TV, V_pad = _choose_vocab_tile(V)

    # LSTM: per-gate (in, out) blocks, biases folded.
    w_ih = jnp.transpose(p["lstm_w_ih"].reshape(4, H, E), (0, 2, 1))     # (4, E, H)
    w_hh = jnp.transpose(p["lstm_w_hh"].reshape(4, H, H), (0, 2, 1))     # (4, H, H)
    b_gates = (p["lstm_b_ih"] + p["lstm_b_hh"]).reshape(4, 1, H)

    # W1 split into the h_t part and the context part, stored (in, out).
    w1_h = p["w1"][:, :H].T                                              # (H, H)
    w1_c = p["w1"][:, H:].T                                              # (2H, H)
    b1 = p["b1"].reshape(1, H)

    # W2 stored (H, V), bf16, padded to a multiple of the vocab tile.
    w2 = p["w2"].T.astype(jnp.bfloat16)
    w2p = jnp.pad(w2, ((0, 0), (0, V_pad - V)))
    b2p = jnp.pad(p["b2"].reshape(1, V), ((0, 0), (0, V_pad - V)),
                  constant_values=_NEG_INF_PAD)

    # Pointer-gen weight split along the [ctx, h, c, emb] segments.
    wg = p["w_gen"]
    wg_ctx = wg[:, :2 * H]
    wg_h = wg[:, 2 * H:3 * H]
    wg_c = wg[:, 3 * H:4 * H]
    wg_e = wg[:, 4 * H:]

    return {
        "embedding": p["embedding"],          # gathered row-wise from HBM
        "w_ih": w_ih, "w_hh": w_hh, "b_gates": b_gates,
        "w1_h": w1_h, "w1_c": w1_c, "b1": b1,
        "w2": w2p, "b2": b2p,
        "wg_ctx": wg_ctx, "wg_h": wg_h, "wg_c": wg_c, "wg_e": wg_e,
        "b_gen": p["b_gen"].reshape(1, 1),
    }


# -----------------------------------------------------------------------------
# Pure-JAX reference (mirrors the PyTorch Decoder.forward)
# -----------------------------------------------------------------------------
def reference_forward(raw, decoder_input, decoder_states, context_vector):
    x = raw["embedding"][decoder_input]                          # (B, E)
    h0 = decoder_states[0][0]
    c0 = decoder_states[1][0]
    H = h0.shape[1]
    gates = (x @ raw["lstm_w_ih"].T + raw["lstm_b_ih"]
             + h0 @ raw["lstm_w_hh"].T + raw["lstm_b_hh"])
    i = jax.nn.sigmoid(gates[:, :H])
    f = jax.nn.sigmoid(gates[:, H:2 * H])
    g = jnp.tanh(gates[:, 2 * H:3 * H])
    o = jax.nn.sigmoid(gates[:, 3 * H:])
    c_t = f * c0 + i * g
    h_t = o * jnp.tanh(c_t)
    concat = jnp.concatenate([h_t, context_vector], axis=1)
    ff1 = concat @ raw["w1"].T + raw["b1"]
    ff2 = ff1 @ raw["w2"].T + raw["b2"]
    p_vocab = jax.nn.softmax(ff2, axis=1)
    p_input = jnp.concatenate([context_vector, h_t, c_t, x], axis=1)
    p_gen = jax.nn.sigmoid(p_input @ raw["w_gen"].T + raw["b_gen"])
    return p_vocab, (h_t[None], c_t[None]), p_gen


if __name__ == "__main__":
    B, S = 4, 8
    vocab_size, embed_size, hidden_size = 64, 32, 32

    key = jax.random.PRNGKey(0)
    k_par, k_in, k_h, k_c, k_enc, k_ctx = jax.random.split(key, 6)

    raw_params = init_params(k_par, vocab_size, embed_size, hidden_size)
    params = prepare_params(raw_params)

    decoder_input = jax.random.randint(k_in, (B,), 0, vocab_size, jnp.int32)
    h0 = jax.random.normal(k_h, (1, B, hidden_size), jnp.float32)
    c0 = jax.random.normal(k_c, (1, B, hidden_size), jnp.float32)
    encoder_output = jax.random.normal(k_enc, (B, S, 2 * hidden_size), jnp.float32)
    context_vector = jax.random.normal(k_ctx, (B, 2 * hidden_size), jnp.float32)

    p_vocab, (h_t, c_t), p_gen = decoder_forward(
        params, decoder_input, (h0, c0), encoder_output, context_vector)
    jax.block_until_ready((p_vocab, h_t, c_t, p_gen))

    # ---- sanity checks ----
    assert p_vocab.shape == (B, vocab_size)
    assert h_t.shape == (1, B, hidden_size) and c_t.shape == (1, B, hidden_size)
    assert p_gen.shape == (B, 1)
    assert bool(jnp.all(jnp.isfinite(p_vocab)))
    # bf16 W2 + approx reciprocal -> slightly looser than the f32-only version.
    assert bool(jnp.allclose(jnp.sum(p_vocab, axis=1), 1.0, atol=5e-3))
    assert bool(jnp.all((p_gen >= 0.0) & (p_gen <= 1.0)))

    # ---- compare against the pure-JAX reference of the PyTorch module ----
    pv_ref, (h_ref, c_ref), pg_ref = reference_forward(
        raw_params, decoder_input, (h0, c0), context_vector)
    assert bool(jnp.allclose(p_vocab, pv_ref, atol=1e-2))
    assert bool(jnp.allclose(h_t, h_ref, atol=1e-2))
    assert bool(jnp.allclose(c_t, c_ref, atol=1e-2))
    assert bool(jnp.allclose(p_gen, pg_ref, atol=1e-2))

    print("KERNEL_OK")
</pallas_src>

<mosaic_0001>
module attributes {stable_mosaic.version = 11 : i64} {
  func.func @_decoder_step_kernel(%arg0: i32, %arg1: memref<8xi32, #tpu.memory_space<smem>>, %arg2: memref<64x32xf32, #tpu.memory_space<any>>, %arg3: memref<8x32xf32, #tpu.memory_space<vmem>>, %arg4: memref<8x32xf32, #tpu.memory_space<vmem>>, %arg5: memref<8x64xf32, #tpu.memory_space<vmem>>, %arg6: memref<4x32x32xf32, #tpu.memory_space<vmem>>, %arg7: memref<4x32x32xf32, #tpu.memory_space<vmem>>, %arg8: memref<4x1x32xf32, #tpu.memory_space<vmem>>, %arg9: memref<32x32xf32, #tpu.memory_space<vmem>>, %arg10: memref<64x32xf32, #tpu.memory_space<vmem>>, %arg11: memref<1x32xf32, #tpu.memory_space<vmem>>, %arg12: memref<32x128xbf16, #tpu.memory_space<vmem>>, %arg13: memref<1x128xf32, #tpu.memory_space<vmem>>, %arg14: memref<1x64xf32, #tpu.memory_space<vmem>>, %arg15: memref<1x32xf32, #tpu.memory_space<vmem>>, %arg16: memref<1x32xf32, #tpu.memory_space<vmem>>, %arg17: memref<1x32xf32, #tpu.memory_space<vmem>>, %arg18: memref<1x1xf32, #tpu.memory_space<vmem>>, %arg19: memref<1x8x128xf32, #tpu.memory_space<vmem>>, %arg20: memref<8x32xf32, #tpu.memory_space<vmem>>, %arg21: memref<8x32xf32, #tpu.memory_space<vmem>>, %arg22: memref<8x128xf32, #tpu.memory_space<vmem>>, %arg23: memref<8x32xf32, #tpu.memory_space<vmem>>, %arg24: memref<8x32xbf16, #tpu.memory_space<vmem>>, %arg25: memref<8x1xf32, #tpu.memory_space<vmem>>, %arg26: memref<8x!tpu.dma_semaphore, #tpu.memory_space<semaphore_mem>>) attributes {dimension_semantics = [#tpu.dimension_semantics<arbitrary>], iteration_bounds = array<i64: 1>, scalar_prefetch = 1 : i64, scratch_operands = 4 : i64, tpu.core_type = #tpu.core_type<tc>, window_params = [{}, {pipeline_mode = #tpu.pipeline_mode<synchronous>, transform_indices = @transform_1, window_bounds = array<i64: 8, 32>}, {pipeline_mode = #tpu.pipeline_mode<synchronous>, transform_indices = @transform_2, window_bounds = array<i64: 8, 32>}, {pipeline_mode = #tpu.pipeline_mode<synchronous>, transform_indices = @transform_3, window_bounds = array<i64: 8, 64>}, {pipeline_mode = #tpu.pipeline_mode<synchronous>, transform_indices = @transform_4, window_bounds = array<i64: 4, 32, 32>}, {pipeline_mode = #tpu.pipeline_mode<synchronous>, transform_indices = @transform_5, window_bounds = array<i64: 4, 32, 32>}, {pipeline_mode = #tpu.pipeline_mode<synchronous>, transform_indices = @transform_6, window_bounds = array<i64: 4, 1, 32>}, {pipeline_mode = #tpu.pipeline_mode<synchronous>, transform_indices = @transform_7, window_bounds = array<i64: 32, 32>}, {pipeline_mode = #tpu.pipeline_mode<synchronous>, transform_indices = @transform_8, window_bounds = array<i64: 64, 32>}, {pipeline_mode = #tpu.pipeline_mode<synchronous>, transform_indices = @transform_9, window_bounds = array<i64: 1, 32>}, {transform_indices = @transform_10, window_bounds = array<i64: 32, 128>}, {transform_indices = @transform_11, window_bounds = array<i64: 1, 128>}, {pipeline_mode = #tpu.pipeline_mode<synchronous>, transform_indices = @transform_12, window_bounds = array<i64: 1, 64>}, {pipeline_mode = #tpu.pipeline_mode<synchronous>, transform_indices = @transform_13, window_bounds = array<i64: 1, 32>}, {pipeline_mode = #tpu.pipeline_mode<synchronous>, transform_indices = @transform_14, window_bounds = array<i64: 1, 32>}, {pipeline_mode = #tpu.pipeline_mode<synchronous>, transform_indices = @transform_15, window_bounds = array<i64: 1, 32>}, {pipeline_mode = #tpu.pipeline_mode<synchronous>, transform_indices = @transform_16, window_bounds = array<i64: 1, 1>}, {pipeline_mode = #tpu.pipeline_mode<synchronous>, transform_indices = @transform_17, window_bounds = array<i64: 1, 8, 128>}, {pipeline_mode = #tpu.pipeline_mode<synchronous>, transform_indices = @transform_18, window_bounds = array<i64: 8, 32>}, {pipeline_mode = #tpu.pipeline_mode<synchronous>, transform_indices = @transform_19, window_bounds = array<i64: 8, 32>}, {pipeline_mode = #tpu.pipeline_mode<synchronous>, transform_indices = @transform_20, window_bounds = array<i64: 8, 128>}]} {
    %c0_i32 = arith.constant 0 : i32
    %0 = arith.cmpi eq, %arg0, %c0_i32 : i32
    %1 = arith.extui %0 : i1 to i32
    %c0_i32_0 = arith.constant 0 : i32
    %2 = arith.cmpi ne, %1, %c0_i32_0 : i32
    scf.if %2 {
      %c0_15 = arith.constant 0 : index
      %21 = memref.load %arg1[%c0_15] : memref<8xi32, #tpu.memory_space<smem>>
      %c0_i32_16 = arith.constant 0 : i32
      %c0_i32_17 = arith.constant 0 : i32
      %22 = tpu.memref_slice %arg2[%21, %c0_i32_17] : memref<64x32xf32, #tpu.memory_space<any>> -> memref<1x32xf32, #tpu.memory_space<any>>
      %c0_i32_18 = arith.constant 0 : i32
      %c0_i32_19 = arith.constant 0 : i32
      %23 = tpu.memref_slice %arg23[%c0_i32_18, %c0_i32_19] : memref<8x32xf32, #tpu.memory_space<vmem>> -> memref<1x32xf32, #tpu.memory_space<vmem>>
      %24 = tpu.memref_slice %arg26[%c0_i32_16] : memref<8x!tpu.dma_semaphore, #tpu.memory_space<semaphore_mem>> -> memref<1x!tpu.dma_semaphore, #tpu.memory_space<semaphore_mem>>
      %25 = tpu.memref_squeeze %24 : memref<1x!tpu.dma_semaphore, #tpu.memory_space<semaphore_mem>> -> memref<!tpu.dma_semaphore, #tpu.memory_space<semaphore_mem>>
      tpu.enqueue_dma source(%22 : memref<1x32xf32, #tpu.memory_space<any>>) target(%23 : memref<1x32xf32, #tpu.memory_space<vmem>>) target_semaphore(%25 : memref<!tpu.dma_semaphore, #tpu.memory_space<semaphore_mem>>)
      %c1 = arith.constant 1 : index
      %26 = memref.load %arg1[%c1] : memref<8xi32, #tpu.memory_space<smem>>
      %c1_i32 = arith.constant 1 : i32
      %c0_i32_20 = arith.constant 0 : i32
      %27 = tpu.memref_slice %arg2[%26, %c0_i32_20] : memref<64x32xf32, #tpu.memory_space<any>> -> memref<1x32xf32, #tpu.memory_space<any>>
      %c1_i32_21 = arith.constant 1 : i32
      %c0_i32_22 = arith.constant 0 : i32
      %28 = tpu.memref_slice %arg23[%c1_i32_21, %c0_i32_22] : memref<8x32xf32, #tpu.memory_space<vmem>> -> memref<1x32xf32, #tpu.memory_space<vmem>>
      %29 = tpu.memref_slice %arg26[%c1_i32] : memref<8x!tpu.dma_semaphore, #tpu.memory_space<semaphore_mem>> -> memref<1x!tpu.dma_semaphore, #tpu.memory_space<semaphore_mem>>
      %30 = tpu.memref_squeeze %29 : memref<1x!tpu.dma_semaphore, #tpu.memory_space<semaphore_mem>> -> memref<!tpu.dma_semaphore, #tpu.memory_space<semaphore_mem>>
      tpu.enqueue_dma source(%27 : memref<1x32xf32, #tpu.memory_space<any>>) target(%28 : memref<1x32xf32, #tpu.memory_space<vmem>>) target_semaphore(%30 : memref<!tpu.dma_semaphore, #tpu.memory_space<semaphore_mem>>)
      %c2 = arith.constant 2 : index
      %31 = memref.load %arg1[%c2] : memref<8xi32, #tpu.memory_space<smem>>
      %c2_i32 = arith.constant 2 : i32
      %c0_i32_23 = arith.constant 0 : i32
      %32 = tpu.memref_slice %arg2[%31, %c0_i32_23] : memref<64x32xf32, #tpu.memory_space<any>> -> memref<1x32xf32, #tpu.memory_space<any>>
      %c2_i32_24 = arith.constant 2 : i32
      %c0_i32_25 = arith.constant 0 : i32
      %33 = tpu.memref_slice %arg23[%c2_i32_24, %c0_i32_25] : memref<8x32xf32, #tpu.memory_space<vmem>> -> memref<1x32xf32, #tpu.memory_space<vmem>>
      %34 = tpu.memref_slice %arg26[%c2_i32] : memref<8x!tpu.dma_semaphore, #tpu.memory_space<semaphore_mem>> -> memref<1x!tpu.dma_semaphore, #tpu.memory_space<semaphore_mem>>
      %35 = tpu.memref_squeeze %34 : memref<1x!tpu.dma_semaphore, #tpu.memory_space<semaphore_mem>> -> memref<!tpu.dma_semaphore, #tpu.memory_space<semaphore_mem>>
      tpu.enqueue_dma source(%32 : memref<1x32xf32, #tpu.memory_space<any>>) target(%33 : memref<1x32xf32, #tpu.memory_space<vmem>>) target_semaphore(%35 : memref<!tpu.dma_semaphore, #tpu.memory_space<semaphore_mem>>)
      %c3 = arith.constant 3 : index
      %36 = memref.load %arg1[%c3] : memref<8xi32, #tpu.memory_space<smem>>
      %c3_i32 = arith.constant 3 : i32
      %c0_i32_26 = arith.constant 0 : i32
      %37 = tpu.memref_slice %arg2[%36, %c0_i32_26] : memref<64x32xf32, #tpu.memory_space<any>> -> memref<1x32xf32, #tpu.memory_space<any>>
      %c3_i32_27 = arith.constant 3 : i32
      %c0_i32_28 = arith.constant 0 : i32
      %38 = tpu.memref_slice %arg23[%c3_i32_27, %c0_i32_28] : memref<8x32xf32, #tpu.memory_space<vmem>> -> memref<1x32xf32, #tpu.memory_space<vmem>>
      %39 = tpu.memref_slice %arg26[%c3_i32] : memref<8x!tpu.dma_semaphore, #tpu.memory_space<semaphore_mem>> -> memref<1x!tpu.dma_semaphore, #tpu.memory_space<semaphore_mem>>
      %40 = tpu.memref_squeeze %39 : memref<1x!tpu.dma_semaphore, #tpu.memory_space<semaphore_mem>> -> memref<!tpu.dma_semaphore, #tpu.memory_space<semaphore_mem>>
      tpu.enqueue_dma source(%37 : memref<1x32xf32, #tpu.memory_space<any>>) target(%38 : memref<1x32xf32, #tpu.memory_space<vmem>>) target_semaphore(%40 : memref<!tpu.dma_semaphore, #tpu.memory_space<semaphore_mem>>)
      %c4 = arith.constant 4 : index
      %41 = memref.load %arg1[%c4] : memref<8xi32, #tpu.memory_space<smem>>
      %c4_i32 = arith.constant 4 : i32
      %c0_i32_29 = arith.constant 0 : i32
      %42 = tpu.memref_slice %arg2[%41, %c0_i32_29] : memref<64x32xf32, #tpu.memory_space<any>> -> memref<1x32xf32, #tpu.memory_space<any>>
      %c4_i32_30 = arith.constant 4 : i32
      %c0_i32_31 = arith.constant 0 : i32
      %43 = tpu.memref_slice %arg23[%c4_i32_30, %c0_i32_31] : memref<8x32xf32, #tpu.memory_space<vmem>> -> memref<1x32xf32, #tpu.memory_space<vmem>>
      %44 = tpu.memref_slice %arg26[%c4_i32] : memref<8x!tpu.dma_semaphore, #tpu.memory_space<semaphore_mem>> -> memref<1x!tpu.dma_semaphore, #tpu.memory_space<semaphore_mem>>
      %45 = tpu.memref_squeeze %44 : memref<1x!tpu.dma_semaphore, #tpu.memory_space<semaphore_mem>> -> memref<!tpu.dma_semaphore, #tpu.memory_space<semaphore_mem>>
      tpu.enqueue_dma source(%42 : memref<1x32xf32, #tpu.memory_space<any>>) target(%43 : memref<1x32xf32, #tpu.memory_space<vmem>>) target_semaphore(%45 : memref<!tpu.dma_semaphore, #tpu.memory_space<semaphore_mem>>)
      %c5 = arith.constant 5 : index
      %46 = memref.load %arg1[%c5] : memref<8xi32, #tpu.memory_space<smem>>
      %c5_i32 = arith.constant 5 : i32
      %c0_i32_32 = arith.constant 0 : i32
      %47 = tpu.memref_slice %arg2[%46, %c0_i32_32] : memref<64x32xf32, #tpu.memory_space<any>> -> memref<1x32xf32, #tpu.memory_space<any>>
      %c5_i32_33 = arith.constant 5 : i32
      %c0_i32_34 = arith.constant 0 : i32
      %48 = tpu.memref_slice %arg23[%c5_i32_33, %c0_i32_34] : memref<8x32xf32, #tpu.memory_space<vmem>> -> memref<1x32xf32, #tpu.memory_space<vmem>>
      %49 = tpu.memref_slice %arg26[%c5_i32] : memref<8x!tpu.dma_semaphore, #tpu.memory_space<semaphore_mem>> -> memref<1x!tpu.dma_semaphore, #tpu.memory_space<semaphore_mem>>
      %50 = tpu.memref_squeeze %49 : memref<1x!tpu.dma_semaphore, #tpu.memory_space<semaphore_mem>> -> memref<!tpu.dma_semaphore, #tpu.memory_space<semaphore_mem>>
      tpu.enqueue_dma source(%47 : memref<1x32xf32, #tpu.memory_space<any>>) target(%48 : memref<1x32xf32, #tpu.memory_space<vmem>>) target_semaphore(%50 : memref<!tpu.dma_semaphore, #tpu.memory_space<semaphore_mem>>)
      %c6 = arith.constant 6 : index
      %51 = memref.load %arg1[%c6] : memref<8xi32, #tpu.memory_space<smem>>
      %c6_i32 = arith.constant 6 : i32
      %c0_i32_35 = arith.constant 0 : i32
      %52 = tpu.memref_slice %arg2[%51, %c0_i32_35] : memref<64x32xf32, #tpu.memory_space<any>> -> memref<1x32xf32, #tpu.memory_space<any>>
      %c6_i32_36 = arith.constant 6 : i32
      %c0_i32_37 = arith.constant 0 : i32
      %53 = tpu.memref_slice %arg23[%c6_i32_36, %c0_i32_37] : memref<8x32xf32, #tpu.memory_space<vmem>> -> memref<1x32xf32, #tpu.memory_space<vmem>>
      %54 = tpu.memref_slice %arg26[%c6_i32] : memref<8x!tpu.dma_semaphore, #tpu.memory_space<semaphore_mem>> -> memref<1x!tpu.dma_semaphore, #tpu.memory_space<semaphore_mem>>
      %55 = tpu.memref_squeeze %54 : memref<1x!tpu.dma_semaphore, #tpu.memory_space<semaphore_mem>> -> memref<!tpu.dma_semaphore, #tpu.memory_space<semaphore_mem>>
      tpu.enqueue_dma source(%52 : memref<1x32xf32, #tpu.memory_space<any>>) target(%53 : memref<1x32xf32, #tpu.memory_space<vmem>>) target_semaphore(%55 : memref<!tpu.dma_semaphore, #tpu.memory_space<semaphore_mem>>)
      %c7 = arith.constant 7 : index
      %56 = memref.load %arg1[%c7] : memref<8xi32, #tpu.memory_space<smem>>
      %c7_i32 = arith.constant 7 : i32
      %c0_i32_38 = arith.constant 0 : i32
      %57 = tpu.memref_slice %arg2[%56, %c0_i32_38] : memref<64x32xf32, #tpu.memory_space<any>> -> memref<1x32xf32, #tpu.memory_space<any>>
      %c7_i32_39 = arith.constant 7 : i32
      %c0_i32_40 = arith.constant 0 : i32
      %58 = tpu.memref_slice %arg23[%c7_i32_39, %c0_i32_40] : memref<8x32xf32, #tpu.memory_space<vmem>> -> memref<1x32xf32, #tpu.memory_space<vmem>>
      %59 = tpu.memref_slice %arg26[%c7_i32] : memref<8x!tpu.dma_semaphore, #tpu.memory_space<semaphore_mem>> -> memref<1x!tpu.dma_semaphore, #tpu.memory_space<semaphore_mem>>
      %60 = tpu.memref_squeeze %59 : memref<1x!tpu.dma_semaphore, #tpu.memory_space<semaphore_mem>> -> memref<!tpu.dma_semaphore, #tpu.memory_space<semaphore_mem>>
      tpu.enqueue_dma source(%57 : memref<1x32xf32, #tpu.memory_space<any>>) target(%58 : memref<1x32xf32, #tpu.memory_space<vmem>>) target_semaphore(%60 : memref<!tpu.dma_semaphore, #tpu.memory_space<semaphore_mem>>)
      %c0_i32_41 = arith.constant 0 : i32
      %c0_i32_42 = arith.constant 0 : i32
      %61 = tpu.memref_slice %arg2[%21, %c0_i32_42] : memref<64x32xf32, #tpu.memory_space<any>> -> memref<1x32xf32, #tpu.memory_space<any>>
      %c0_i32_43 = arith.constant 0 : i32
      %c0_i32_44 = arith.constant 0 : i32
      %62 = tpu.memref_slice %arg23[%c0_i32_43, %c0_i32_44] : memref<8x32xf32, #tpu.memory_space<vmem>> -> memref<1x32xf32, #tpu.memory_space<vmem>>
      %63 = tpu.memref_slice %arg26[%c0_i32_41] : memref<8x!tpu.dma_semaphore, #tpu.memory_space<semaphore_mem>> -> memref<1x!tpu.dma_semaphore, #tpu.memory_space<semaphore_mem>>
      %64 = tpu.memref_squeeze %63 : memref<1x!tpu.dma_semaphore, #tpu.memory_space<semaphore_mem>> -> memref<!tpu.dma_semaphore, #tpu.memory_space<semaphore_mem>>
      tpu.wait_dma2 semaphore(%64 : memref<!tpu.dma_semaphore, #tpu.memory_space<semaphore_mem>>) src(%61 : memref<1x32xf32, #tpu.memory_space<any>>) dst(%62 : memref<1x32xf32, #tpu.memory_space<vmem>>)
      %c1_i32_45 = arith.constant 1 : i32
      %c0_i32_46 = arith.constant 0 : i32
      %65 = tpu.memref_slice %arg2[%26, %c0_i32_46] : memref<64x32xf32, #tpu.memory_space<any>> -> memref<1x32xf32, #tpu.memory_space<any>>
      %c1_i32_47 = arith.constant 1 : i32
      %c0_i32_48 = arith.constant 0 : i32
      %66 = tpu.memref_slice %arg23[%c1_i32_47, %c0_i32_48] : memref<8x32xf32, #tpu.memory_space<vmem>> -> memref<1x32xf32, #tpu.memory_space<vmem>>
      %67 = tpu.memref_slice %arg26[%c1_i32_45] : memref<8x!tpu.dma_semaphore, #tpu.memory_space<semaphore_mem>> -> memref<1x!tpu.dma_semaphore, #tpu.memory_space<semaphore_mem>>
      %68 = tpu.memref_squeeze %67 : memref<1x!tpu.dma_semaphore, #tpu.memory_space<semaphore_mem>> -> memref<!tpu.dma_semaphore, #tpu.memory_space<semaphore_mem>>
      tpu.wait_dma2 semaphore(%68 : memref<!tpu.dma_semaphore, #tpu.memory_space<semaphore_mem>>) src(%65 : memref<1x32xf32, #tpu.memory_space<any>>) dst(%66 : memref<1x32xf32, #tpu.memory_space<vmem>>)
      %c2_i32_49 = arith.constant 2 : i32
      %c0_i32_50 = arith.constant 0 : i32
      %69 = tpu.memref_slice %arg2[%31, %c0_i32_50] : memref<64x32xf32, #tpu.memory_space<any>> -> memref<1x32xf32, #tpu.memory_space<any>>
      %c2_i32_51 = arith.constant 2 : i32
      %c0_i32_52 = arith.constant 0 : i32
      %70 = tpu.memref_slice %arg23[%c2_i32_51, %c0_i32_52] : memref<8x32xf32, #tpu.memory_space<vmem>> -> memref<1x32xf32, #tpu.memory_space<vmem>>
      %71 = tpu.memref_slice %arg26[%c2_i32_49] : memref<8x!tpu.dma_semaphore, #tpu.memory_space<semaphore_mem>> -> memref<1x!tpu.dma_semaphore, #tpu.memory_space<semaphore_mem>>
      %72 = tpu.memref_squeeze %71 : memref<1x!tpu.dma_semaphore, #tpu.memory_space<semaphore_mem>> -> memref<!tpu.dma_semaphore, #tpu.memory_space<semaphore_mem>>
      tpu.wait_dma2 semaphore(%72 : memref<!tpu.dma_semaphore, #tpu.memory_space<semaphore_mem>>) src(%69 : memref<1x32xf32, #tpu.memory_space<any>>) dst(%70 : memref<1x32xf32, #tpu.memory_space<vmem>>)
      %c3_i32_53 = arith.constant 3 : i32
      %c0_i32_54 = arith.constant 0 : i32
      %73 = tpu.memref_slice %arg2[%36, %c0_i32_54] : memref<64x32xf32, #tpu.memory_space<any>> -> memref<1x32xf32, #tpu.memory_space<any>>
      %c3_i32_55 = arith.constant 3 : i32
      %c0_i32_56 = arith.constant 0 : i32
      %74 = tpu.memref_slice %arg23[%c3_i32_55, %c0_i32_56] : memref<8x32xf32, #tpu.memory_space<vmem>> -> memref<1x32xf32, #tpu.memory_space<vmem>>
      %75 = tpu.memref_slice %arg26[%c3_i32_53] : memref<8x!tpu.dma_semaphore, #tpu.memory_space<semaphore_mem>> -> memref<1x!tpu.dma_semaphore, #tpu.memory_space<semaphore_mem>>
      %76 = tpu.memref_squeeze %75 : memref<1x!tpu.dma_semaphore, #tpu.memory_space<semaphore_mem>> -> memref<!tpu.dma_semaphore, #tpu.memory_space<semaphore_mem>>
      tpu.wait_dma2 semaphore(%76 : memref<!tpu.dma_semaphore, #tpu.memory_space<semaphore_mem>>) src(%73 : memref<1x32xf32, #tpu.memory_space<any>>) dst(%74 : memref<1x32xf32, #tpu.memory_space<vmem>>)
      %c4_i32_57 = arith.constant 4 : i32
      %c0_i32_58 = arith.constant 0 : i32
      %77 = tpu.memref_slice %arg2[%41, %c0_i32_58] : memref<64x32xf32, #tpu.memory_space<any>> -> memref<1x32xf32, #tpu.memory_space<any>>
      %c4_i32_59 = arith.constant 4 : i32
      %c0_i32_60 = arith.constant 0 : i32
      %78 = tpu.memref_slice %arg23[%c4_i32_59, %c0_i32_60] : memref<8x32xf32, #tpu.memory_space<vmem>> -> memref<1x32xf32, #tpu.memory_space<vmem>>
      %79 = tpu.memref_slice %arg26[%c4_i32_57] : memref<8x!tpu.dma_semaphore, #tpu.memory_space<semaphore_mem>> -> memref<1x!tpu.dma_semaphore, #tpu.memory_space<semaphore_mem>>
      %80 = tpu.memref_squeeze %79 : memref<1x!tpu.dma_semaphore, #tpu.memory_space<semaphore_mem>> -> memref<!tpu.dma_semaphore, #tpu.memory_space<semaphore_mem>>
      tpu.wait_dma2 semaphore(%80 : memref<!tpu.dma_semaphore, #tpu.memory_space<semaphore_mem>>) src(%77 : memref<1x32xf32, #tpu.memory_space<any>>) dst(%78 : memref<1x32xf32, #tpu.memory_space<vmem>>)
      %c5_i32_61 = arith.constant 5 : i32
      %c0_i32_62 = arith.constant 0 : i32
      %81 = tpu.memref_slice %arg2[%46, %c0_i32_62] : memref<64x32xf32, #tpu.memory_space<any>> -> memref<1x32xf32, #tpu.memory_space<any>>
      %c5_i32_63 = arith.constant 5 : i32
      %c0_i32_64 = arith.constant 0 : i32
      %82 = tpu.memref_slice %arg23[%c5_i32_63, %c0_i32_64] : memref<8x32xf32, #tpu.memory_space<vmem>> -> memref<1x32xf32, #tpu.memory_space<vmem>>
      %83 = tpu.memref_slice %arg26[%c5_i32_61] : memref<8x!tpu.dma_semaphore, #tpu.memory_space<semaphore_mem>> -> memref<1x!tpu.dma_semaphore, #tpu.memory_space<semaphore_mem>>
      %84 = tpu.memref_squeeze %83 : memref<1x!tpu.dma_semaphore, #tpu.memory_space<semaphore_mem>> -> memref<!tpu.dma_semaphore, #tpu.memory_space<semaphore_mem>>
      tpu.wait_dma2 semaphore(%84 : memref<!tpu.dma_semaphore, #tpu.memory_space<semaphore_mem>>) src(%81 : memref<1x32xf32, #tpu.memory_space<any>>) dst(%82 : memref<1x32xf32, #tpu.memory_space<vmem>>)
      %c6_i32_65 = arith.constant 6 : i32
      %c0_i32_66 = arith.constant 0 : i32
      %85 = tpu.memref_slice %arg2[%51, %c0_i32_66] : memref<64x32xf32, #tpu.memory_space<any>> -> memref<1x32xf32, #tpu.memory_space<any>>
      %c6_i32_67 = arith.constant 6 : i32
      %c0_i32_68 = arith.constant 0 : i32
      %86 = tpu.memref_slice %arg23[%c6_i32_67, %c0_i32_68] : memref<8x32xf32, #tpu.memory_space<vmem>> -> memref<1x32xf32, #tpu.memory_space<vmem>>
      %87 = tpu.memref_slice %arg26[%c6_i32_65] : memref<8x!tpu.dma_semaphore, #tpu.memory_space<semaphore_mem>> -> memref<1x!tpu.dma_semaphore, #tpu.memory_space<semaphore_mem>>
      %88 = tpu.memref_squeeze %87 : memref<1x!tpu.dma_semaphore, #tpu.memory_space<semaphore_mem>> -> memref<!tpu.dma_semaphore, #tpu.memory_space<semaphore_mem>>
      tpu.wait_dma2 semaphore(%88 : memref<!tpu.dma_semaphore, #tpu.memory_space<semaphore_mem>>) src(%85 : memref<1x32xf32, #tpu.memory_space<any>>) dst(%86 : memref<1x32xf32, #tpu.memory_space<vmem>>)
      %c7_i32_69 = arith.constant 7 : i32
      %c0_i32_70 = arith.constant 0 : i32
      %89 = tpu.memref_slice %arg2[%56, %c0_i32_70] : memref<64x32xf32, #tpu.memory_space<any>> -> memref<1x32xf32, #tpu.memory_space<any>>
      %c7_i32_71 = arith.constant 7 : i32
      %c0_i32_72 = arith.constant 0 : i32
      %90 = tpu.memref_slice %arg23[%c7_i32_71, %c0_i32_72] : memref<8x32xf32, #tpu.memory_space<vmem>> -> memref<1x32xf32, #tpu.memory_space<vmem>>
      %91 = tpu.memref_slice %arg26[%c7_i32_69] : memref<8x!tpu.dma_semaphore, #tpu.memory_space<semaphore_mem>> -> memref<1x!tpu.dma_semaphore, #tpu.memory_space<semaphore_mem>>
      %92 = tpu.memref_squeeze %91 : memref<1x!tpu.dma_semaphore, #tpu.memory_space<semaphore_mem>> -> memref<!tpu.dma_semaphore, #tpu.memory_space<semaphore_mem>>
      tpu.wait_dma2 semaphore(%92 : memref<!tpu.dma_semaphore, #tpu.memory_space<semaphore_mem>>) src(%89 : memref<1x32xf32, #tpu.memory_space<any>>) dst(%90 : memref<1x32xf32, #tpu.memory_space<vmem>>)
      %c0_73 = arith.constant 0 : index
      %c0_74 = arith.constant 0 : index
      %93 = vector.load %arg23[%c0_73, %c0_74] : memref<8x32xf32, #tpu.memory_space<vmem>>, vector<8x32xf32>
      %c0_75 = arith.constant 0 : index
      %c0_76 = arith.constant 0 : index
      %94 = vector.load %arg3[%c0_75, %c0_76] : memref<8x32xf32, #tpu.memory_space<vmem>>, vector<8x32xf32>
      %c0_77 = arith.constant 0 : index
      %c0_78 = arith.constant 0 : index
      %95 = vector.load %arg4[%c0_77, %c0_78] : memref<8x32xf32, #tpu.memory_space<vmem>>, vector<8x32xf32>
      %c0_79 = arith.constant 0 : index
      %c0_80 = arith.constant 0 : index
      %96 = vector.load %arg5[%c0_79, %c0_80] : memref<8x64xf32, #tpu.memory_space<vmem>>, vector<8x64xf32>
      %c0_81 = arith.constant 0 : index
      %c0_82 = arith.constant 0 : index
      %c0_83 = arith.constant 0 : index
      %97 = vector.load %arg6[%c0_81, %c0_82, %c0_83] : memref<4x32x32xf32, #tpu.memory_space<vmem>>, vector<1x32x32xf32>
      %98 = vector.shape_cast %97 : vector<1x32x32xf32> to vector<32x32xf32>
      %cst_84 = arith.constant dense<0.000000e+00> : vector<8x32xf32>
      %99 = tpu.matmul %93, %98, %cst_84 {dimension_numbers = #tpu.dot_dimension_numbers<[1], [0], [0], [1], [0, 0, 1, 1], [], []>} : vector<8x32xf32>, vector<32x32xf32>, vector<8x32xf32> -> vector<8x32xf32>
      %c0_85 = arith.constant 0 : index
      %c0_86 = arith.constant 0 : index
      %c0_87 = arith.constant 0 : index
      %100 = vector.load %arg7[%c0_85, %c0_86, %c0_87] : memref<4x32x32xf32, #tpu.memory_space<vmem>>, vector<1x32x32xf32>
      %101 = vector.shape_cast %100 : vector<1x32x32xf32> to vector<32x32xf32>
      %cst_88 = arith.constant dense<0.000000e+00> : vector<8x32xf32>
      %102 = tpu.matmul %94, %101, %cst_88 {dimension_numbers = #tpu.dot_dimension_numbers<[1], [0], [0], [1], [0, 0, 1, 1], [], []>} : vector<8x32xf32>, vector<32x32xf32>, vector<8x32xf32> -> vector<8x32xf32>
      %103 = arith.addf %99, %102 : vector<8x32xf32>
      %c0_89 = arith.constant 0 : index
      %c0_90 = arith.constant 0 : index
      %c0_91 = arith.constant 0 : index
      %104 = vector.load %arg8[%c0_89, %c0_90, %c0_91] : memref<4x1x32xf32, #tpu.memory_space<vmem>>, vector<1x1x32xf32>
      %105 = vector.shape_cast %104 : vector<1x1x32xf32> to vector<1x32xf32>
      %106 = vector.broadcast %105 : vector<1x32xf32> to vector<8x32xf32>
      %107 = arith.addf %103, %106 : vector<8x32xf32>
      %108 = arith.negf %107 : vector<8x32xf32>
      %109 = math.exp %108 : vector<8x32xf32>
      %cst_92 = arith.constant 1.000000e+00 : f32
      %110 = vector.broadcast %cst_92 : f32 to vector<8x32xf32>
      %111 = arith.addf %110, %109 : vector<8x32xf32>
      %112 = arith.divf %110, %111 : vector<8x32xf32>
      %c1_93 = arith.constant 1 : index
      %c0_94 = arith.constant 0 : index
      %c0_95 = arith.constant 0 : index
      %113 = vector.load %arg6[%c1_93, %c0_94, %c0_95] : memref<4x32x32xf32, #tpu.memory_space<vmem>>, vector<1x32x32xf32>
      %114 = vector.shape_cast %113 : vector<1x32x32xf32> to vector<32x32xf32>
      %cst_96 = arith.constant dense<0.000000e+00> : vector<8x32xf32>
      %115 = tpu.matmul %93, %114, %cst_96 {dimension_numbers = #tpu.dot_dimension_numbers<[1], [0], [0], [1], [0, 0, 1, 1], [], []>} : vector<8x32xf32>, vector<32x32xf32>, vector<8x32xf32> -> vector<8x32xf32>
      %c1_97 = arith.constant 1 : index
      %c0_98 = arith.constant 0 : index
      %c0_99 = arith.constant 0 : index
      %116 = vector.load %arg7[%c1_97, %c0_98, %c0_99] : memref<4x32x32xf32, #tpu.memory_space<vmem>>, vector<1x32x32xf32>
      %117 = vector.shape_cast %116 : vector<1x32x32xf32> to vector<32x32xf32>
      %cst_100 = arith.constant dense<0.000000e+00> : vector<8x32xf32>
      %118 = tpu.matmul %94, %117, %cst_100 {dimension_numbers = #tpu.dot_dimension_numbers<[1], [0], [0], [1], [0, 0, 1, 1], [], []>} : vector<8x32xf32>, vector<32x32xf32>, vector<8x32xf32> -> vector<8x32xf32>
      %119 = arith.addf %115, %118 : vector<8x32xf32>
      %c1_101 = arith.constant 1 : index
      %c0_102 = arith.constant 0 : index
      %c0_103 = arith.constant 0 : index
      %120 = vector.load %arg8[%c1_101, %c0_102, %c0_103] : memref<4x1x32xf32, #tpu.memory_space<vmem>>, vector<1x1x32xf32>
      %121 = vector.shape_cast %120 : vector<1x1x32xf32> to vector<1x32xf32>
      %122 = vector.broadcast %121 : vector<1x32xf32> to vector<8x32xf32>
      %123 = arith.addf %119, %122 : vector<8x32xf32>
      %124 = arith.negf %123 : vector<8x32xf32>
      %125 = math.exp %124 : vector<8x32xf32>
      %cst_104 = arith.constant 1.000000e+00 : f32
      %126 = vector.broadcast %cst_104 : f32 to vector<8x32xf32>
      %127 = arith.addf %126, %125 : vector<8x32xf32>
      %128 = arith.divf %126, %127 : vector<8x32xf32>
      %c2_105 = arith.constant 2 : index
      %c0_106 = arith.constant 0 : index
      %c0_107 = arith.constant 0 : index
      %129 = vector.load %arg6[%c2_105, %c0_106, %c0_107] : memref<4x32x32xf32, #tpu.memory_space<vmem>>, vector<1x32x32xf32>
      %130 = vector.shape_cast %129 : vector<1x32x32xf32> to vector<32x32xf32>
      %cst_108 = arith.constant dense<0.000000e+00> : vector<8x32xf32>
      %131 = tpu.matmul %93, %130, %cst_108 {dimension_numbers = #tpu.dot_dimension_numbers<[1], [0], [0], [1], [0, 0, 1, 1], [], []>} : vector<8x32xf32>, vector<32x32xf32>, vector<8x32xf32> -> vector<8x32xf32>
      %c2_109 = arith.constant 2 : index
      %c0_110 = arith.constant 0 : index
      %c0_111 = arith.constant 0 : index
      %132 = vector.load %arg7[%c2_109, %c0_110, %c0_111] : memref<4x32x32xf32, #tpu.memory_space<vmem>>, vector<1x32x32xf32>
      %133 = vector.shape_cast %132 : vector<1x32x32xf32> to vector<32x32xf32>
      %cst_112 = arith.constant dense<0.000000e+00> : vector<8x32xf32>
      %134 = tpu.matmul %94, %133, %cst_112 {dimension_numbers = #tpu.dot_dimension_numbers<[1], [0], [0], [1], [0, 0, 1, 1], [], []>} : vector<8x32xf32>, vector<32x32xf32>, vector<8x32xf32> -> vector<8x32xf32>
      %135 = arith.addf %131, %134 : vector<8x32xf32>
      %c2_113 = arith.constant 2 : index
      %c0_114 = arith.constant 0 : index
      %c0_115 = arith.constant 0 : index
      %136 = vector.load %arg8[%c2_113, %c0_114, %c0_115] : memref<4x1x32xf32, #tpu.memory_space<vmem>>, vector<1x1x32xf32>
      %137 = vector.shape_cast %136 : vector<1x1x32xf32> to vector<1x32xf32>
      %138 = vector.broadcast %137 : vector<1x32xf32> to vector<8x32xf32>
      %139 = arith.addf %135, %138 : vector<8x32xf32>
      %140 = math.tanh %139 : vector<8x32xf32>
      %c3_116 = arith.constant 3 : index
      %c0_117 = arith.constant 0 : index
      %c0_118 = arith.constant 0 : index
      %141 = vector.load %arg6[%c3_116, %c0_117, %c0_118] : memref<4x32x32xf32, #tpu.memory_space<vmem>>, vector<1x32x32xf32>
      %142 = vector.shape_cast %141 : vector<1x32x32xf32> to vector<32x32xf32>
      %cst_119 = arith.constant dense<0.000000e+00> : vector<8x32xf32>
      %143 = tpu.matmul %93, %142, %cst_119 {dimension_numbers = #tpu.dot_dimension_numbers<[1], [0], [0], [1], [0, 0, 1, 1], [], []>} : vector<8x32xf32>, vector<32x32xf32>, vector<8x32xf32> -> vector<8x32xf32>
      %c3_120 = arith.constant 3 : index
      %c0_121 = arith.constant 0 : index
      %c0_122 = arith.constant 0 : index
      %144 = vector.load %arg7[%c3_120, %c0_121, %c0_122] : memref<4x32x32xf32, #tpu.memory_space<vmem>>, vector<1x32x32xf32>
      %145 = vector.shape_cast %144 : vector<1x32x32xf32> to vector<32x32xf32>
      %cst_123 = arith.constant dense<0.000000e+00> : vector<8x32xf32>
      %146 = tpu.matmul %94, %145, %cst_123 {dimension_numbers = #tpu.dot_dimension_numbers<[1], [0], [0], [1], [0, 0, 1, 1], [], []>} : vector<8x32xf32>, vector<32x32xf32>, vector<8x32xf32> -> vector<8x32xf32>
      %147 = arith.addf %143, %146 : vector<8x32xf32>
      %c3_124 = arith.constant 3 : index
      %c0_125 = arith.constant 0 : index
      %c0_126 = arith.constant 0 : index
      %148 = vector.load %arg8[%c3_124, %c0_125, %c0_126] : memref<4x1x32xf32, #tpu.memory_space<vmem>>, vector<1x1x32xf32>
      %149 = vector.shape_cast %148 : vector<1x1x32xf32> to vector<1x32xf32>
      %150 = vector.broadcast %149 : vector<1x32xf32> to vector<8x32xf32>
      %151 = arith.addf %147, %150 : vector<8x32xf32>
      %152 = arith.negf %151 : vector<8x32xf32>
      %153 = math.exp %152 : vector<8x32xf32>
      %cst_127 = arith.constant 1.000000e+00 : f32
      %154 = vector.broadcast %cst_127 : f32 to vector<8x32xf32>
      %155 = arith.addf %154, %153 : vector<8x32xf32>
      %156 = arith.divf %154, %155 : vector<8x32xf32>
      %157 = arith.mulf %128, %95 : vector<8x32xf32>
      %158 = arith.mulf %112, %140 : vector<8x32xf32>
      %159 = arith.addf %157, %158 : vector<8x32xf32>
      %160 = math.tanh %159 : vector<8x32xf32>
      %161 = arith.mulf %156, %160 : vector<8x32xf32>
      %c0_128 = arith.constant 0 : index
      %c0_129 = arith.constant 0 : index
      %162 = vector.load %arg9[%c0_128, %c0_129] : memref<32x32xf32, #tpu.memory_space<vmem>>, vector<32x32xf32>
      %cst_130 = arith.constant dense<0.000000e+00> : vector<8x32xf32>
      %163 = tpu.matmul %161, %162, %cst_130 {dimension_numbers = #tpu.dot_dimension_numbers<[1], [0], [0], [1], [0, 0, 1, 1], [], []>} : vector<8x32xf32>, vector<32x32xf32>, vector<8x32xf32> -> vector<8x32xf32>
      %c0_131 = arith.constant 0 : index
      %c0_132 = arith.constant 0 : index
      %164 = vector.load %arg10[%c0_131, %c0_132] : memref<64x32xf32, #tpu.memory_space<vmem>>, vector<64x32xf32>
      %cst_133 = arith.constant dense<0.000000e+00> : vector<8x32xf32>
      %165 = tpu.matmul %96, %164, %cst_133 {dimension_numbers = #tpu.dot_dimension_numbers<[1], [0], [0], [1], [0, 0, 1, 1], [], []>} : vector<8x64xf32>, vector<64x32xf32>, vector<8x32xf32> -> vector<8x32xf32>
      %166 = arith.addf %163, %165 : vector<8x32xf32>
      %c0_134 = arith.constant 0 : index
      %c0_135 = arith.constant 0 : index
      %167 = vector.load %arg11[%c0_134, %c0_135] : memref<1x32xf32, #tpu.memory_space<vmem>>, vector<1x32xf32>
      %168 = vector.broadcast %167 : vector<1x32xf32> to vector<8x32xf32>
      %169 = arith.addf %166, %168 : vector<8x32xf32>
      %170 = arith.truncf %169 : vector<8x32xf32> to vector<8x32xbf16>
      %c0_136 = arith.constant 0 : index
      %c0_137 = arith.constant 0 : index
      %171 = vector.load %arg24[%c0_136, %c0_137] : memref<8x32xbf16, #tpu.memory_space<vmem>>, vector<8x32xbf16>
      tpu.vector_store %arg24[%c0_136, %c0_137], %170 {strides = array<i32>} : memref<8x32xbf16, #tpu.memory_space<vmem>>, vector<8x32xbf16>,
      %c0_138 = arith.constant 0 : index
      %c0_139 = arith.constant 0 : index
      %172 = vector.load %arg20[%c0_138, %c0_139] : memref<8x32xf32, #tpu.memory_space<vmem>>, vector<8x32xf32>
      tpu.vector_store %arg20[%c0_138, %c0_139], %161 {strides = array<i32>} : memref<8x32xf32, #tpu.memory_space<vmem>>, vector<8x32xf32>,
      %c0_140 = arith.constant 0 : index
      %c0_141 = arith.constant 0 : index
      %173 = vector.load %arg21[%c0_140, %c0_141] : memref<8x32xf32, #tpu.memory_space<vmem>>, vector<8x32xf32>
      tpu.vector_store %arg21[%c0_140, %c0_141], %159 {strides = array<i32>} : memref<8x32xf32, #tpu.memory_space<vmem>>, vector<8x32xf32>,
      %c0_142 = arith.constant 0 : index
      %c0_143 = arith.constant 0 : index
      %174 = vector.load %arg14[%c0_142, %c0_143] : memref<1x64xf32, #tpu.memory_space<vmem>>, vector<1x64xf32>
      %175 = vector.broadcast %174 : vector<1x64xf32> to vector<8x64xf32>
      %176 = arith.mulf %96, %175 : vector<8x64xf32>
      %cst_144 = arith.constant dense<0.000000e+00> : vector<8xf32>
      %177 = vector.multi_reduction <add>, %176, %cst_144 [1] : vector<8x64xf32> to vector<8xf32>
      %178 = vector.shape_cast %177 : vector<8xf32> to vector<8x1xf32>
      %c0_145 = arith.constant 0 : index
      %c0_146 = arith.constant 0 : index
      %179 = vector.load %arg15[%c0_145, %c0_146] : memref<1x32xf32, #tpu.memory_space<vmem>>, vector<1x32xf32>
      %180 = vector.broadcast %179 : vector<1x32xf32> to vector<8x32xf32>
      %181 = arith.mulf %161, %180 : vector<8x32xf32>
      %cst_147 = arith.constant dense<0.000000e+00> : vector<8xf32>
      %182 = vector.multi_reduction <add>, %181, %cst_147 [1] : vector<8x32xf32> to vector<8xf32>
      %183 = vector.shape_cast %182 : vector<8xf32> to vector<8x1xf32>
      %184 = arith.addf %178, %183 : vector<8x1xf32>
      %c0_148 = arith.constant 0 : index
      %c0_149 = arith.constant 0 : index
      %185 = vector.load %arg16[%c0_148, %c0_149] : memref<1x32xf32, #tpu.memory_space<vmem>>, vector<1x32xf32>
      %186 = vector.broadcast %185 : vector<1x32xf32> to vector<8x32xf32>
      %187 = arith.mulf %159, %186 : vector<8x32xf32>
      %cst_150 = arith.constant dense<0.000000e+00> : vector<8xf32>
      %188 = vector.multi_reduction <add>, %187, %cst_150 [1] : vector<8x32xf32> to vector<8xf32>
      %189 = vector.shape_cast %188 : vector<8xf32> to vector<8x1xf32>
      %190 = arith.addf %184, %189 : vector<8x1xf32>
      %c0_151 = arith.constant 0 : index
      %c0_152 = arith.constant 0 : index
      %191 = vector.load %arg17[%c0_151, %c0_152] : memref<1x32xf32, #tpu.memory_space<vmem>>, vector<1x32xf32>
      %192 = vector.broadcast %191 : vector<1x32xf32> to vector<8x32xf32>
      %193 = arith.mulf %93, %192 : vector<8x32xf32>
      %cst_153 = arith.constant dense<0.000000e+00> : vector<8xf32>
      %194 = vector.multi_reduction <add>, %193, %cst_153 [1] : vector<8x32xf32> to vector<8xf32>
      %195 = vector.shape_cast %194 : vector<8xf32> to vector<8x1xf32>
      %196 = arith.addf %190, %195 : vector<8x1xf32>
      %c0_154 = arith.constant 0 : index
      %c0_155 = arith.constant 0 : index
      %197 = vector.load %arg18[%c0_154, %c0_155] : memref<1x1xf32, #tpu.memory_space<vmem>>, vector<1x1xf32>
      %198 = vector.broadcast %197 : vector<1x1xf32> to vector<8x1xf32>
      %199 = arith.addf %196, %198 : vector<8x1xf32>
      %200 = arith.negf %199 : vector<8x1xf32>
      %201 = math.exp %200 : vector<8x1xf32>
      %cst_156 = arith.constant 1.000000e+00 : f32
      %202 = vector.broadcast %cst_156 : f32 to vector<8x1xf32>
      %203 = arith.addf %202, %201 : vector<8x1xf32>
      %204 = arith.divf %202, %203 : vector<8x1xf32>
      %205 = vector.shape_cast %204 : vector<8x1xf32> to vector<8x1xf32>
      %206 = vector.broadcast %205 : vector<8x1xf32> to vector<8x128xf32>
      %c0_157 = arith.constant 0 : index
      %c0_158 = arith.constant 0 : index
      %207 = vector.load %arg22[%c0_157, %c0_158] : memref<8x128xf32, #tpu.memory_space<vmem>>, vector<8x128xf32>
      tpu.vector_store %arg22[%c0_157, %c0_158], %206 {strides = array<i32>} : memref<8x128xf32, #tpu.memory_space<vmem>>, vector<8x128xf32>,
      %cst_159 = arith.constant 0xFF800000 : f32
      %208 = vector.broadcast %cst_159 : f32 to vector<8x1xf32>
      %c0_160 = arith.constant 0 : index
      %c0_161 = arith.constant 0 : index
      %209 = vector.load %arg25[%c0_160, %c0_161] : memref<8x1xf32, #tpu.memory_space<vmem>>, vector<8x1xf32>
      tpu.vector_store %arg25[%c0_160, %c0_161], %208 {strides = array<i32>} : memref<8x1xf32, #tpu.memory_space<vmem>>, vector<8x1xf32>,
    } else {
    }
    %c0 = arith.constant 0 : index
    %c0_1 = arith.constant 0 : index
    %3 = vector.load %arg24[%c0, %c0_1] : memref<8x32xbf16, #tpu.memory_space<vmem>>, vector<8x32xbf16>
    %c0_2 = arith.constant 0 : index
    %c0_3 = arith.constant 0 : index
    %4 = vector.load %arg12[%c0_2, %c0_3] : memref<32x128xbf16, #tpu.memory_space<vmem>>, vector<32x128xbf16>
    %cst = arith.constant dense<0.000000e+00> : vector<8x128xf32>
    %5 = tpu.matmul %3, %4, %cst {dimension_numbers = #tpu.dot_dimension_numbers<[1], [0], [0], [1], [0, 0, 1, 1], [], []>} : vector<8x32xbf16>, vector<32x128xbf16>, vector<8x128xf32> -> vector<8x128xf32>
    %c0_4 = arith.constant 0 : index
    %c0_5 = arith.constant 0 : index
    %6 = vector.load %arg13[%c0_4, %c0_5] : memref<1x128xf32, #tpu.memory_space<vmem>>, vector<1x128xf32>
    %7 = vector.broadcast %6 : vector<1x128xf32> to vector<8x128xf32>
    %8 = arith.addf %5, %7 : vector<8x128xf32>
    %9 = arith.index_cast %arg0 : i32 to index
    %c0_6 = arith.constant 0 : index
    %c0_7 = arith.constant 0 : index
    %10 = vector.load %arg19[%9, %c0_6, %c0_7] : memref<1x8x128xf32, #tpu.memory_space<vmem>>, vector<1x8x128xf32>
    %11 = vector.shape_cast %10 : vector<1x8x128xf32> to vector<8x128xf32>
    %12 = vector.shape_cast %8 : vector<8x128xf32> to vector<1x8x128xf32>
    tpu.vector_store %arg19[%9, %c0_6, %c0_7], %12 {strides = array<i32>} : memref<1x8x128xf32, #tpu.memory_space<vmem>>, vector<1x8x128xf32>,
    %c0_8 = arith.constant 0 : index
    %c0_9 = arith.constant 0 : index
    %13 = vector.load %arg25[%c0_8, %c0_9] : memref<8x1xf32, #tpu.memory_space<vmem>>, vector<8x1xf32>
    %cst_10 = arith.constant dense<0xFF800000> : vector<8xf32>
    %14 = vector.multi_reduction <maximumf>, %8, %cst_10 [1] : vector<8x128xf32> to vector<8xf32>
    %15 = vector.shape_cast %14 : vector<8xf32> to vector<8x1xf32>
    %16 = arith.maximumf %13, %15 : vector<8x1xf32>
    %c0_11 = arith.constant 0 : index
    %c0_12 = arith.constant 0 : index
    %17 = vector.load %arg25[%c0_11, %c0_12] : memref<8x1xf32, #tpu.memory_space<vmem>>, vector<8x1xf32>
    tpu.vector_store %arg25[%c0_11, %c0_12], %16 {strides = array<i32>} : memref<8x1xf32, #tpu.memory_space<vmem>>, vector<8x1xf32>,
    %c0_i32_13 = arith.constant 0 : i32
    %18 = arith.cmpi eq, %arg0, %c0_i32_13 : i32
    %19 = arith.extui %18 : i1 to i32
    %c0_i32_14 = arith.constant 0 : i32
    %20 = arith.cmpi ne, %19, %c0_i32_14 : i32
    scf.if %20 {
      %c0_15 = arith.constant 0 : index
      %c0_16 = arith.constant 0 : index
      %c0_17 = arith.constant 0 : index
      %21 = vector.load %arg19[%c0_15, %c0_16, %c0_17] : memref<1x8x128xf32, #tpu.memory_space<vmem>>, vector<1x8x128xf32>
      %c0_18 = arith.constant 0 : index
      %c0_19 = arith.constant 0 : index
      %22 = vector.load %arg25[%c0_18, %c0_19] : memref<8x1xf32, #tpu.memory_space<vmem>>, vector<8x1xf32>
      %23 = vector.shape_cast %22 : vector<8x1xf32> to vector<1x8x1xf32>
      %24 = vector.broadcast %23 : vector<1x8x1xf32> to vector<1x8x128xf32>
      %25 = arith.subf %21, %24 : vector<1x8x128xf32>
      %26 = math.exp %25 : vector<1x8x128xf32>
      %cst_20 = arith.constant dense<0.000000e+00> : vector<1x8xf32>
      %27 = vector.multi_reduction <add>, %26, %cst_20 [2] : vector<1x8x128xf32> to vector<1x8xf32>
      %28 = vector.shape_cast %27 : vector<1x8xf32> to vector<1x8x1xf32>
      %cst_21 = arith.constant dense<0.000000e+00> : vector<8x1xf32>
      %29 = vector.multi_reduction <add>, %28, %cst_21 [0] : vector<1x8x1xf32> to vector<8x1xf32>
      %30 = vector.shape_cast %29 : vector<8x1xf32> to vector<1x8x1xf32>
      %31 = tpu.reciprocal %30 {approx = true} : vector<1x8x1xf32> -> vector<1x8x1xf32>
      %32 = vector.broadcast %31 : vector<1x8x1xf32> to vector<1x8x128xf32>
      %33 = arith.mulf %26, %32 : vector<1x8x128xf32>
      %c0_22 = arith.constant 0 : index
      %c0_23 = arith.constant 0 : index
      %c0_24 = arith.constant 0 : index
      %34 = vector.load %arg19[%c0_22, %c0_23, %c0_24] : memref<1x8x128xf32, #tpu.memory_space<vmem>>, vector<1x8x128xf32>
      tpu.vector_store %arg19[%c0_22, %c0_23, %c0_24], %33 {strides = array<i32>} : memref<1x8x128xf32, #tpu.memory_space<vmem>>, vector<1x8x128xf32>,
    } else {
    }
    return
  }
  func.func @transform_1(%arg0: i32, %arg1: memref<8xi32, #tpu.memory_space<smem>>) -> (i32, i32) {
    %c0_i32 = arith.constant 0 : i32
    %c0_i32_0 = arith.constant 0 : i32
    %c0_i32_1 = arith.constant 0 : i32
    return %c0_i32, %c0_i32_0 : i32, i32
  }
  func.func @transform_2(%arg0: i32, %arg1: memref<8xi32, #tpu.memory_space<smem>>) -> (i32, i32) {
    %c0_i32 = arith.constant 0 : i32
    %c0_i32_0 = arith.constant 0 : i32
    %c0_i32_1 = arith.constant 0 : i32
    return %c0_i32, %c0_i32_0 : i32, i32
  }
  func.func @transform_3(%arg0: i32, %arg1: memref<8xi32, #tpu.memory_space<smem>>) -> (i32, i32) {
    %c0_i32 = arith.constant 0 : i32
    %c0_i32_0 = arith.constant 0 : i32
    %c0_i32_1 = arith.constant 0 : i32
    return %c0_i32, %c0_i32_0 : i32, i32
  }
  func.func @transform_4(%arg0: i32, %arg1: memref<8xi32, #tpu.memory_space<smem>>) -> (i32, i32, i32) {
    %c0_i32 = arith.constant 0 : i32
    %c0_i32_0 = arith.constant 0 : i32
    %c0_i32_1 = arith.constant 0 : i32
    %c0_i32_2 = arith.constant 0 : i32
    return %c0_i32, %c0_i32_0, %c0_i32_1 : i32, i32, i32
  }
  func.func @transform_5(%arg0: i32, %arg1: memref<8xi32, #tpu.memory_space<smem>>) -> (i32, i32, i32) {
    %c0_i32 = arith.constant 0 : i32
    %c0_i32_0 = arith.constant 0 : i32
    %c0_i32_1 = arith.constant 0 : i32
    %c0_i32_2 = arith.constant 0 : i32
    return %c0_i32, %c0_i32_0, %c0_i32_1 : i32, i32, i32
  }
  func.func @transform_6(%arg0: i32, %arg1: memref<8xi32, #tpu.memory_space<smem>>) -> (i32, i32, i32) {
    %c0_i32 = arith.constant 0 : i32
    %c0_i32_0 = arith.constant 0 : i32
    %c0_i32_1 = arith.constant 0 : i32
    %c0_i32_2 = arith.constant 0 : i32
    return %c0_i32, %c0_i32_0, %c0_i32_1 : i32, i32, i32
  }
  func.func @transform_7(%arg0: i32, %arg1: memref<8xi32, #tpu.memory_space<smem>>) -> (i32, i32) {
    %c0_i32 = arith.constant 0 : i32
    %c0_i32_0 = arith.constant 0 : i32
    %c0_i32_1 = arith.constant 0 : i32
    return %c0_i32, %c0_i32_0 : i32, i32
  }
  func.func @transform_8(%arg0: i32, %arg1: memref<8xi32, #tpu.memory_space<smem>>) -> (i32, i32) {
    %c0_i32 = arith.constant 0 : i32
    %c0_i32_0 = arith.constant 0 : i32
    %c0_i32_1 = arith.constant 0 : i32
    return %c0_i32, %c0_i32_0 : i32, i32
  }
  func.func @transform_9(%arg0: i32, %arg1: memref<8xi32, #tpu.memory_space<smem>>) -> (i32, i32) {
    %c0_i32 = arith.constant 0 : i32
    %c0_i32_0 = arith.constant 0 : i32
    %c0_i32_1 = arith.constant 0 : i32
    return %c0_i32, %c0_i32_0 : i32, i32
  }
  func.func @transform_10(%arg0: i32, %arg1: memref<8xi32, #tpu.memory_space<smem>>) -> (i32, i32) {
    %c0_i32 = arith.constant 0 : i32
    %c0_i32_0 = arith.constant 0 : i32
    return %c0_i32, %arg0 : i32, i32
  }
  func.func @transform_11(%arg0: i32, %arg1: memref<8xi32, #tpu.memory_space<smem>>) -> (i32, i32) {
    %c0_i32 = arith.constant 0 : i32
    %c0_i32_0 = arith.constant 0 : i32
    return %c0_i32, %arg0 : i32, i32
  }
  func.func @transform_12(%arg0: i32, %arg1: memref<8xi32, #tpu.memory_space<smem>>) -> (i32, i32) {
    %c0_i32 = arith.constant 0 : i32
    %c0_i32_0 = arith.constant 0 : i32
    %c0_i32_1 = arith.constant 0 : i32
    return %c0_i32, %c0_i32_0 : i32, i32
  }
  func.func @transform_13(%arg0: i32, %arg1: memref<8xi32, #tpu.memory_space<smem>>) -> (i32, i32) {
    %c0_i32 = arith.constant 0 : i32
    %c0_i32_0 = arith.constant 0 : i32
    %c0_i32_1 = arith.constant 0 : i32
    return %c0_i32, %c0_i32_0 : i32, i32
  }
  func.func @transform_14(%arg0: i32, %arg1: memref<8xi32, #tpu.memory_space<smem>>) -> (i32, i32) {
    %c0_i32 = arith.constant 0 : i32
    %c0_i32_0 = arith.constant 0 : i32
    %c0_i32_1 = arith.constant 0 : i32
    return %c0_i32, %c0_i32_0 : i32, i32
  }
  func.func @transform_15(%arg0: i32, %arg1: memref<8xi32, #tpu.memory_space<smem>>) -> (i32, i32) {
    %c0_i32 = arith.constant 0 : i32
    %c0_i32_0 = arith.constant 0 : i32
    %c0_i32_1 = arith.constant 0 : i32
    return %c0_i32, %c0_i32_0 : i32, i32
  }
  func.func @transform_16(%arg0: i32, %arg1: memref<8xi32, #tpu.memory_space<smem>>) -> (i32, i32) {
    %c0_i32 = arith.constant 0 : i32
    %c0_i32_0 = arith.constant 0 : i32
    %c0_i32_1 = arith.constant 0 : i32
    return %c0_i32, %c0_i32_0 : i32, i32
  }
  func.func @transform_17(%arg0: i32, %arg1: memref<8xi32, #tpu.memory_space<smem>>) -> (i32, i32, i32) {
    %c0_i32 = arith.constant 0 : i32
    %c0_i32_0 = arith.constant 0 : i32
    %c0_i32_1 = arith.constant 0 : i32
    %c0_i32_2 = arith.constant 0 : i32
    return %c0_i32, %c0_i32_0, %c0_i32_1 : i32, i32, i32
  }
  func.func @transform_18(%arg0: i32, %arg1: memref<8xi32, #tpu.memory_space<smem>>) -> (i32, i32) {
    %c0_i32 = arith.constant 0 : i32
    %c0_i32_0 = arith.constant 0 : i32
    %c0_i32_1 = arith.constant 0 : i32
    return %c0_i32, %c0_i32_0 : i32, i32
  }
  func.func @transform_19(%arg0: i32, %arg1: memref<8xi32, #tpu.memory_space<smem>>) -> (i32, i32) {
    %c0_i32 = arith.constant 0 : i32
    %c0_i32_0 = arith.constant 0 : i32
    %c0_i32_1 = arith.constant 0 : i32
    return %c0_i32, %c0_i32_0 : i32, i32
  }
  func.func @transform_20(%arg0: i32, %arg1: memref<8xi32, #tpu.memory_space<smem>>) -> (i32, i32) {
    %c0_i32 = arith.constant 0 : i32
    %c0_i32_0 = arith.constant 0 : i32
    %c0_i32_1 = arith.constant 0 : i32
    return %c0_i32, %c0_i32_0 : i32, i32
  }
}

</mosaic_0001>

<bundles_post_ra>
// kernel: decoder_forward.1
= control target key start
LH: loop header
LB: loop body
LE: loop exit
PB: predicated region body
PF: predicated region fallthrough
CT: control target
= control target key end

     0   :  { %s2690_s0 = inlined_call_operand.vmem [shape: s32[8], index: 0, kind: input, shape index: {}]   ;;  %s2691_s1 = inlined_call_operand.vmem [shape: f32[64,32], index: 1, kind: input, shape index: {}]   ;;  %s2692_s2 = inlined_call_operand.vmem [shape: f32[8,32], index: 2, kind: input, shape index: {}]   ;;  %s2693_s3 = inlined_call_operand.vmem [shape: f32[8,32], index: 3, kind: input, shape index: {}]   ;;  %s2694_s4 = inlined_call_operand.vmem [shape: f32[8,64], index: 4, kind: input, shape index: {}]   ;;  %s2695_s5 = inlined_call_operand.vmem [shape: f32[4,32,32], index: 5, kind: input, shape index: {}]   ;;  %s2696_s6 = inlined_call_operand.vmem [shape: f32[4,32,32], index: 6, kind: input, shape index: {}]   ;;  %s2697_s7 = inlined_call_operand.hbm [shape: f32[4,1,32], index: 7, kind: input, shape index: {}]   ;;  %s2698_s8 = inlined_call_operand.hbm [shape: f32[32,32], index: 8, kind: input, shape index: {}]   ;;  %s2699_s9 = inlined_call_operand.vmem [shape: f32[64,32], index: 9, kind: input, shape index: {}]   ;;  %s2700_s10 = inlined_call_operand.hbm [shape: f32[1,32], index: 10, kind: input, shape index: {}]   ;;  %s2701_s11 = inlined_call_operand.hbm [shape: bf16[32,128], index: 11, kind: input, shape index: {}]   ;;  %s2702_s12 = inlined_call_operand.hbm [shape: f32[1,128], index: 12, kind: input, shape index: {}]   ;;  %s2703_s13 = inlined_call_operand.vmem [shape: f32[1,64], index: 13, kind: input, shape index: {}]   ;;  %s2704_s14 = inlined_call_operand.hbm [shape: f32[1,32], index: 14, kind: input, shape index: {}]   ;;  %s2705_s15 = inlined_call_operand.hbm [shape: f32[1,32], index: 15, kind: input, shape index: {}]   ;;  %s2706_s16 = inlined_call_operand.hbm [shape: f32[1,32], index: 16, kind: input, shape index: {}]   ;;  %s2707_s18 = inlined_call_operand.vmem [shape: f32[1,8,128], index: 18, kind: output, shape index: {0}]   ;;  %s2708_s19 = inlined_call_operand.vmem [shape: f32[8,32], index: 19, kind: output, shape index: {1}]   ;;  %s2709_s20 = inlined_call_operand.vmem [shape: f32[8,32], index: 20, kind: output, shape index: {2}]   ;;  %s2710_s21 = inlined_call_operand.vmem [shape: f32[8,128], index: 21, kind: output, shape index: {3}]   ;;  %s2711_s17 = inlined_call_operand.<no memory space> [shape: f32[1,1], index: 17, kind: input, shape index: {}]  }
   0x1   :  { %2714 = sst [smem:[#allocation44_spill]] %s2690_s0  ;;  %v31_v0 = vstv %s2711_s17 }
   0x2   :  { %2715 = sst [smem:[#allocation45_spill]] %s2691_s1  ;;  %32 = vst [vmem:[#allocation8] sm:$0x1] %v31_v0 }
   0x3   :  { %2716 = sst [smem:[#allocation46_spill]] %s2692_s2 }
   0x4   :  { %2717 = sst [smem:[#allocation47_spill]] %s2693_s3 }
   0x5   :  { %2718 = sst [smem:[#allocation48_spill]] %s2694_s4 }
   0x6   :  { %2719 = sst [smem:[#allocation49_spill]] %s2695_s5 }
   0x7   :  { %2720 = sst [smem:[#allocation50_spill]] %s2703_s13 }
   0x8   :  { %s2721_s26 = sld [smem:[#allocation44_spill]] }
   0xe   :  { %s27_s13 = sshll.u32 %s2721_s26, 4  ;;  %s28_s13 = int_to_ptr.vmem [resolvable:$true] %s27_s13 }
   0xf   :  { %s2059_s28 = scalar_lea.vmem %s28_s13, 16  ;;  %p2064_p1 = scmp.lt.s32.totalorder %s28_s13, %s28_s13 }
  0x10   :  { %p2060_p0 = scmp.ne.s32.totalorder %s28_s13, %s2059_s28  ;;  %p2065_p2 = scmp.lt.s32.totalorder %s2059_s28, %s2059_s28 }
  0x12   :  { %p2066_p3 = por %p2065_p2, %p2064_p1 }
  0x14   :  { %p2067_p4 = pnand %p2066_p3, %p2060_p0 }
  0x16   :  { %2070 = shalt.err (!%p2067_p4)  }
  0x17   :  { %s2259_s29 = smov [#allocation7]  }
  0x18   :  { %30 = dma.vmem_to_smem %s28_s13, 16, %s2259_s29, [#allocation6] }
  0x19   :  { %2231 = dma.done.wait [#allocation6], 16 }
  0x1a   :  { %2232 = vsyncadd [#allocation6], 4294967280 }
  0x1b   :  { %34 = sfence }
  0x1c   :  { %35 = vsyncpa [#allocation10], 0 }
  0x1d   :  { %36 = vsyncpa [#allocation12], 0 }
  0x1e   :  { %37 = vsyncpa [#allocation15], 0 }
  0x1f   :  { %38 = vsyncpa [#allocation18], 0 }
  0x20   :  { %39 = vsyncpa [#allocation21], 0  ;;  %s2260_s17 = smov [#allocation11]  }
  0x21   :  { %s67_s0 = sshll.u32 %s2260_s17, 4  ;;  %s68_s0 = int_to_ptr.vmem [resolvable:$true] %s67_s0 }
  0x22   :  { %s2079_s4 = scalar_lea.vmem %s68_s0, 512  ;;  %p2084_p6 = scmp.lt.s32.totalorder %s68_s0, %s68_s0 }
  0x23   :  { %p2080_p5 = scmp.ne.s32.totalorder %s68_s0, %s2079_s4  ;;  %p2085_p7 = scmp.lt.s32.totalorder %s2079_s4, %s2079_s4 }
  0x25   :  { %p2086_p8 = por %p2085_p7, %p2084_p6 }
  0x27   :  { %p2087_p9 = pnand %p2086_p8, %p2080_p5 }
  0x29   :  { %2090 = shalt.err (!%p2087_p9)
}
  0x2a   :  { %s2261_s30 = smov 128   ;;  %s2262_s13 = smov 8  }
  0x2b   :  { %73 = dma.hbm_to_vmem [thread:$0]  %s2698_s8, 512, %s68_s0, [#allocation12], %s2261_s30, %s2261_s30, %s2262_s13  }
  0x2c   :  { %s2263_s23 = smov [#allocation14]  }
  0x2d   :  { %s91_s1 = sshll.u32 %s2263_s23, 4  ;;  %s92_s1 = int_to_ptr.vmem [resolvable:$true] %s91_s1 }
  0x2e   :  { %s2099_s24 = scalar_lea.vmem %s92_s1, 256  ;;  %p2104_p11 = scmp.lt.s32.totalorder %s92_s1, %s92_s1 }
  0x2f   :  { %p2100_p10 = scmp.ne.s32.totalorder %s92_s1, %s2099_s24  ;;  %p2105_p12 = scmp.lt.s32.totalorder %s2099_s24, %s2099_s24 }
  0x31   :  { %p2106_p13 = por %p2105_p12, %p2104_p11 }
  0x33   :  { %p2107_p0 = pnand %p2106_p13, %p2100_p10 }
  0x35   :  { %2110 = shalt.err (!%p2107_p0)
}
  0x36   :  { %s2264_s2 = smov 64   ;;  %s2265_s25 = smov 4  }
  0x37   :  { %97 = dma.hbm_to_vmem [thread:$0]  %s2701_s11, 256, %s92_s1, [#allocation15], %s2264_s2, %s2264_s2, %s2265_s25  }
  0x38   :  { %s2266_s3 = smov [#allocation17]   ;;  %s2267_s29 = smov [#allocation9]  }
  0x39   :  { %s116_s28 = sshll.u32 %s2266_s3, 4  ;;  %s55_s8 = sshll.u32 %s2267_s29, 4  ;;  %s117_s28 = int_to_ptr.vmem [resolvable:$true] %s116_s28  ;;  %s56_s8 = int_to_ptr.vmem [resolvable:$true] %s55_s8 }
  0x3a   :  { %s2119_s17 = scalar_lea.vmem %s117_s28, 16  ;;  %s2123_s0 = scalar_lea.vmem %s117_s28, 32 }
  0x3b   :  { %p2120_p1 = scmp.ne.s32.totalorder %s117_s28, %s2119_s17  ;;  %p2124_p2 = scmp.lt.s32.totalorder %s117_s28, %s117_s28 }
  0x3c   :  { %p2125_p3 = scmp.lt.s32.totalorder %s2123_s0, %s2119_s17 }
  0x3e   :  { %p2126_p4 = por %p2125_p3, %p2124_p2 }
  0x40   :  { %p2127_p5 = pnand %p2126_p4, %p2120_p1 }
  0x42   :  { %2130 = shalt.err (!%p2127_p5)
}
  0x43   :  { %119 = dma.hbm_to_vmem [thread:$0]  %s2704_s14, 16, %s117_s28, [#allocation18]  }
  0x44   :  { %s2139_s13 = scalar_lea.vmem %s56_s8, 64  ;;  %p2144_p7 = scmp.lt.s32.totalorder %s56_s8, %s56_s8 }
  0x45   :  { %p2140_p6 = scmp.ne.s32.totalorder %s56_s8, %s2139_s13  ;;  %p2145_p8 = scmp.lt.s32.totalorder %s2139_s13, %s2139_s13 }
  0x47   :  { %p2146_p9 = por %p2145_p8, %p2144_p7 }
  0x49   :  { %p2147_p10 = pnand %p2146_p9, %p2140_p6 }
  0x4b   :  { %2150 = shalt.err (!%p2147_p10)
}
  0x4c   :  { %s2268_s11 = smov 16   ;;  %s2269_s5 = smov 1  }
  0x4d   :  { %61 = dma.hbm_to_vmem [thread:$0]  %s2697_s7, 64, %s56_s8, [#allocation10], %s2268_s11, %s2268_s11, %s2269_s5  }
  0x4e   :  { %s2270_s1 = smov [#allocation13]   ;;  %s2271_s2 = smov [#allocation16]  }
  0x4f   :  { %s82_s24 = sshll.u32 %s2270_s1, 4  ;;  %s104_s25 = sshll.u32 %s2271_s2, 4  ;;  %s83_s24 = int_to_ptr.vmem [resolvable:$true] %s82_s24  ;;  %s105_s25 = int_to_ptr.vmem [resolvable:$true] %s104_s25 }
  0x50   :  { %s2159_s14 = scalar_lea.vmem %s83_s24, 16  ;;  %s2163_s26 = scalar_lea.vmem %s83_s24, 32 }
  0x51   :  { %p2160_p11 = scmp.ne.s32.totalorder %s83_s24, %s2159_s14  ;;  %p2164_p12 = scmp.lt.s32.totalorder %s83_s24, %s83_s24 }
  0x52   :  { %p2165_p13 = scmp.lt.s32.totalorder %s2163_s26, %s2159_s14 }
  0x54   :  { %p2166_p0 = por %p2165_p13, %p2164_p12 }
  0x56   :  { %p2167_p1 = pnand %p2166_p0, %p2160_p11 }
  0x58   :  { %2170 = shalt.err (!%p2167_p1)
}
  0x59   :  { %85 = dma.hbm_to_vmem [thread:$0]  %s2700_s10, 16, %s83_s24, [#allocation12]  }
  0x5a   :  { %s2179_s28 = scalar_lea.vmem %s105_s25, 16  ;;  %s2183_s7 = scalar_lea.vmem %s105_s25, 32 }
  0x5b   :  { %p2180_p2 = scmp.ne.s32.totalorder %s105_s25, %s2179_s28  ;;  %p2184_p3 = scmp.lt.s32.totalorder %s105_s25, %s105_s25 }
  0x5c   :  { %p2185_p4 = scmp.lt.s32.totalorder %s2183_s7, %s2179_s28 }
  0x5e   :  { %p2186_p5 = por %p2185_p4, %p2184_p3 }
  0x60   :  { %p2187_p6 = pnand %p2186_p5, %p2180_p2 }
  0x62   :  { %2190 = shalt.err (!%p2187_p6)
}
  0x63   :  { %107 = dma.hbm_to_vmem [thread:$0]  %s2702_s12, 16, %s105_s25, [#allocation15]  }
  0x64   :  { %s2272_s17 = smov [#allocation19]   ;;  %s2273_s4 = smov [#allocation20]  }
  0x65   :  { %s126_s0 = sshll.u32 %s2272_s17, 4  ;;  %s136_s30 = sshll.u32 %s2273_s4, 4  ;;  %s127_s0 = int_to_ptr.vmem [resolvable:$true] %s126_s0  ;;  %s137_s30 = int_to_ptr.vmem [resolvable:$true] %s136_s30 }
  0x66   :  { %s2199_s13 = scalar_lea.vmem %s127_s0, 16  ;;  %s2203_s10 = scalar_lea.vmem %s127_s0, 32 }
  0x67   :  { %p2200_p7 = scmp.ne.s32.totalorder %s127_s0, %s2199_s13  ;;  %p2204_p8 = scmp.lt.s32.totalorder %s127_s0, %s127_s0 }
  0x68   :  { %p2205_p9 = scmp.lt.s32.totalorder %s2203_s10, %s2199_s13 }
  0x6a   :  { %p2206_p10 = por %p2205_p9, %p2204_p8 }
  0x6c   :  { %p2207_p11 = pnand %p2206_p10, %p2200_p7 }
  0x6e   :  { %2210 = shalt.err (!%p2207_p11)
}
  0x6f   :  { %129 = dma.hbm_to_vmem [thread:$0]  %s2705_s15, 16, %s127_s0, [#allocation18]  }
  0x70   :  { %s2219_s22 = scalar_lea.vmem %s137_s30, 16  ;;  %s2223_s12 = scalar_lea.vmem %s137_s30, 32 }
  0x71   :  { %p2220_p12 = scmp.ne.s32.totalorder %s137_s30, %s2219_s22  ;;  %p2224_p13 = scmp.lt.s32.totalorder %s137_s30, %s137_s30 }
  0x72   :  { %p2225_p0 = scmp.lt.s32.totalorder %s2223_s12, %s2219_s22 }
  0x74   :  { %p2226_p1 = por %p2225_p0, %p2224_p13 }
  0x76   :  { %p2227_p2 = pnand %p2226_p1, %p2220_p12 }
  0x78   :  { %2230 = shalt.err (!%p2227_p2)
}
  0x79   :  { %139 = dma.hbm_to_vmem [thread:$0]  %s2706_s16, 16, %s137_s30, [#allocation21]  }
  0x7a   :  { %2233 = dma.done.wait [#allocation10], 64  }
  0x7b   :  { %2234 = vsyncadd [#allocation10], 4294967232 }
  0x7c   :  { %2235 = dma.done.wait [#allocation12], 528  }
  0x7d   :  { %2236 = vsyncadd [#allocation12], 4294966768 }
  0x7e   :  { %2237 = dma.done.wait [#allocation15], 272  }
  0x7f   :  { %2238 = vsyncadd [#allocation15], 4294967024 }
  0x80   :  { %2239 = dma.done.wait [#allocation18], 32  }
  0x81   :  { %2240 = vsyncadd [#allocation18], 4294967264 }
  0x82   :  { %2241 = dma.done.wait [#allocation21], 16  }
  0x83   :  { %2242 = vsyncadd [#allocation21], 4294967280  ;;  %s171_s15 = sld [smem:[#allocation7]] }
  0x84   :  { %s2722_s25 = sld [smem:[#allocation45_spill]] }
  0x8a   :  { %s172_s14 = scalar_lea.vmem %s2722_s25, %s171_s15 }
  0x8b   :  { %v191_v1 = vld [vmem:[%s172_s14] sm:$0x1] }
  0x8c   :  { %192 = vst [vmem:[#allocation2] sm:$0x1] %v191_v1 }
  0x8d   :  { %218 = vsyncadd [#allocation5], 16  ;;  %s1762_s26 = sld [smem:[#allocation7 + $0x1]] }
  0x93   :  { %s220_s3 = scalar_lea.vmem %s2722_s25, %s1762_s26 }
  0x94   :  { %v241_v2 = vld [vmem:[%s220_s3] sm:$0x1] }
  0x95   :  { %242 = vst [vmem:[#allocation2 + $0x1] sm:$0x1] %v241_v2 }
  0x96   :  { %268 = vsyncadd [#allocation5 + $0x1], 16  ;;  %s1763_s28 = sld [smem:[#allocation7 + $0x2]] }
  0x9c   :  { %s270_s8 = scalar_lea.vmem %s2722_s25, %s1763_s28 }
  0x9d   :  { %v291_v3 = vld [vmem:[%s270_s8] sm:$0x1] }
  0x9e   :  { %292 = vst [vmem:[#allocation2 + $0x2] sm:$0x1] %v291_v3 }
  0x9f   :  { %318 = vsyncadd [#allocation5 + $0x2], 16  ;;  %s1764_s17 = sld [smem:[#allocation7 + $0x3]] }
  0xa5   :  { %s320_s30 = scalar_lea.vmem %s2722_s25, %s1764_s17 }
  0xa6   :  { %v341_v4 = vld [vmem:[%s320_s30] sm:$0x1] }
  0xa7   :  { %342 = vst [vmem:[#allocation2 + $0x3] sm:$0x1] %v341_v4 }
  0xa8   :  { %368 = vsyncadd [#allocation5 + $0x3], 16  ;;  %s1765_s13 = sld [smem:[#allocation7 + $0x4]] }
  0xae   :  { %s370_s5 = scalar_lea.vmem %s2722_s25, %s1765_s13 }
  0xaf   :  { %v391_v5 = vld [vmem:[%s370_s5] sm:$0x1] }
  0xb0   :  { %392 = vst [vmem:[#allocation2 + $0x4] sm:$0x1] %v391_v5 }
  0xb1   :  { %418 = vsyncadd [#allocation5 + $0x4], 16  ;;  %s1766_s22 = sld [smem:[#allocation7 + $0x5]] }
  0xb7   :  { %s420_s1 = scalar_lea.vmem %s2722_s25, %s1766_s22 }
  0xb8   :  { %v441_v6 = vld [vmem:[%s420_s1] sm:$0x1] }
  0xb9   :  { %442 = vst [vmem:[#allocation2 + $0x5] sm:$0x1] %v441_v6 }
  0xba   :  { %468 = vsyncadd [#allocation5 + $0x5], 16  ;;  %s1767_s15 = sld [smem:[#allocation7 + $0x6]] }
  0xc0   :  { %s470_s14 = scalar_lea.vmem %s2722_s25, %s1767_s15 }
  0xc1   :  { %v491_v7 = vld [vmem:[%s470_s14] sm:$0x1] }
  0xc2   :  { %492 = vst [vmem:[#allocation2 + $0x6] sm:$0x1] %v491_v7 }
  0xc3   :  { %518 = vsyncadd [#allocation5 + $0x6], 16  ;;  %s1768_s26 = sld [smem:[#allocation7 + $0x7]] }
  0xc9   :  { %s520_s3 = scalar_lea.vmem %s2722_s25, %s1768_s26 }
  0xca   :  { %v541_v8 = vld [vmem:[%s520_s3] sm:$0x1] }
  0xcb   :  { %542 = vst [vmem:[#allocation2 + $0x7] sm:$0x1] %v541_v8 }
  0xcc   :  { %568 = vsyncadd [#allocation5 + $0x7], 16 }
  0xcd   :  { %2243 = dma.done.wait [#allocation5], 16 }
  0xce   :  { %2244 = vsyncadd [#allocation5], 4294967280 }
  0xcf   :  { %2245 = dma.done.wait [#allocation5 + $0x1], 16 }
  0xd0   :  { %2246 = vsyncadd [#allocation5 + $0x1], 4294967280 }
  0xd1   :  { %2247 = dma.done.wait [#allocation5 + $0x2], 16 }
  0xd2   :  { %2248 = vsyncadd [#allocation5 + $0x2], 4294967280 }
  0xd3   :  { %2249 = dma.done.wait [#allocation5 + $0x3], 16 }
  0xd4   :  { %2250 = vsyncadd [#allocation5 + $0x3], 4294967280 }
  0xd5   :  { %2251 = dma.done.wait [#allocation5 + $0x4], 16 }
  0xd6   :  { %2252 = vsyncadd [#allocation5 + $0x4], 4294967280 }
  0xd7   :  { %2253 = dma.done.wait [#allocation5 + $0x5], 16 }
  0xd8   :  { %2254 = vsyncadd [#allocation5 + $0x5], 4294967280 }
  0xd9   :  { %2255 = dma.done.wait [#allocation5 + $0x6], 16 }
  0xda   :  { %2256 = vsyncadd [#allocation5 + $0x6], 4294967280 }
  0xdb   :  { %2257 = dma.done.wait [#allocation5 + $0x7], 16 }
  0xdc   :  { %2258 = vsyncadd [#allocation5 + $0x7], 4294967280  ;;  %v2274_v9 = vmov 0.0   ;;  %vm2275_vm0 = vmmov 0   ;;  %v597_v10 = vld [vmem:[%s2696_s6 + $0x18] sm:$0xff]  ;;  %s2723_s8 = sld [smem:[#allocation49_spill]] }
  0xdd   :  { %1886 = vmatprep.subr.mxu0 %v2274_v9  ;;  %1897 = vmatprep.subr.mxu1 %v2274_v9  ;;  %v596_v12 = vld [vmem:[%s2696_s6 + $0x10] sm:$0xff]  ;;  %v595_v14 = vld [vmem:[%s2696_s6 + $0x8] sm:$0xff]  ;;  %v594_v16 = vld [vmem:[%s2696_s6] sm:$0xff]  ;;  %s2724_s2 = sld [smem:[#allocation46_spill]]  ;;  %vm598_vm1 = vcmask 261120   ;;  %vm1266_vm2 = vcmask 523264  }
  0xde   :  { %1894 = vmatprep.mubr.msk.f32.mxu0 %vm2275_vm0, %v2274_v9  ;;  %1905 = vmatprep.mubr.msk.f32.mxu1 %vm2275_vm0, %v2274_v9  ;;  %v2481_v19 = vld [vmem:[#allocation2] sm:$0xff]  ;;  %v1780_v20 = vld [vmem:[%s2696_s6 + $0x38] sm:$0xff]  ;;  %v1779_v22 = vld [vmem:[%s2696_s6 + $0x30] sm:$0xff]  ;;  %s2725_s5 = sld [smem:[#allocation48_spill]]  ;;  %vm1422_vm3 = vcmask 257024   ;;  %vm1493_vm4 = vcmask 7168  }
  0xdf   :  { %1887 = vmatpush3.msra.mxu0 %v597_v10  ;;  %v1778_v24 = vld [vmem:[%s2696_s6 + $0x28] sm:$0xff]  ;;  %v1777_v26 = vld [vmem:[%s2696_s6 + $0x20] sm:$0xff]  ;;  %v1792_v28 = vld [vmem:[%s2696_s6 + $0x58] sm:$0xff]  ;;  %s2726_s12 = sld [smem:[#allocation47_spill]] }
  0xe0   :  { %1888 = vmatprep.subr.mxu0 %v2274_v9  ;;  %v1791_v30 = vld [vmem:[%s2696_s6 + $0x50] sm:$0xff]  ;;  %v1790_v32 = vld [vmem:[%s2696_s6 + $0x48] sm:$0xff]  ;;  %v1789_v34 = vld [vmem:[%s2696_s6 + $0x40] sm:$0xff] }
  0xe1   :  { %1889 = vmatpush3.msra.mxu0 %v596_v12  ;;  %v1803_v36 = vld [vmem:[%s2696_s6 + $0x78] sm:$0xff]  ;;  %v1802_v38 = vld [vmem:[%s2696_s6 + $0x70] sm:$0xff]  ;;  %v1801_v40 = vld [vmem:[%s2696_s6 + $0x68] sm:$0xff] }
  0xe2   :  { %v593_v11 = vld [vmem:[%s2723_s8 + $0x18] sm:$0xff]  ;;  %v592_v13 = vld [vmem:[%s2723_s8 + $0x10] sm:$0xff]  ;;  %v591_v15 = vld [vmem:[%s2723_s8 + $0x8] sm:$0xff]  ;;  %1890 = vmatprep.subr.mxu0 %v2274_v9 }
  0xe3   :  { %1898 = vmatpush3.msra.mxu1 %v593_v11  ;;  %v590_v17 = vld [vmem:[%s2723_s8] sm:$0xff]  ;;  %1891 = vmatpush3.msra.mxu0 %v595_v14  ;;  %v1776_v21 = vld [vmem:[%s2723_s8 + $0x38] sm:$0xff]  ;;  %v1775_v23 = vld [vmem:[%s2723_s8 + $0x30] sm:$0xff] }
  0xe4   :  { %1899 = vmatprep.subr.mxu1 %v2274_v9  ;;  %v2479_v18 = vld [vmem:[%s2724_s2] sm:$0xff]  ;;  %1892 = vmatprep.subr.mxu0 %v2274_v9  ;;  %v1774_v25 = vld [vmem:[%s2723_s8 + $0x28] sm:$0xff]  ;;  %v1788_v29 = vld [vmem:[%s2723_s8 + $0x58] sm:$0xff]  ;;  %s2727_s2 = sld [smem:[#allocation50_spill]] }
  0xe5   :  { %1900 = vmatpush3.msra.mxu1 %v592_v13  ;;  %1893 = vmatpush3.msra.mxu0 %v594_v16  ;;  %v1773_v27 = vld [vmem:[%s2723_s8 + $0x20] sm:$0xff]  ;;  %v1787_v31 = vld [vmem:[%s2723_s8 + $0x50] sm:$0xff]  ;;  %v1786_v33 = vld [vmem:[%s2723_s8 + $0x48] sm:$0xff] }
  0xe6   :  { %1901 = vmatprep.subr.mxu1 %v2274_v9  ;;  %1895 = vmatmul.mubr.msk.f32.vlgmr.msra.gmra.mxu0 %vm598_vm1, %v2479_v18  ;;  %v1785_v35 = vld [vmem:[%s2723_s8 + $0x40] sm:$0xff]  ;;  %v1799_v37 = vld [vmem:[%s2723_s8 + $0x78] sm:$0xff]  ;;  %v1798_v39 = vld [vmem:[%s2723_s8 + $0x70] sm:$0xff] }
  0xe7   :  { %1902 = vmatpush3.msra.mxu1 %v591_v15  ;;  %1908 = vmatprep.subr.mxu0 %v2274_v9  ;;  %v1797_v41 = vld [vmem:[%s2723_s8 + $0x68] sm:$0xff]  ;;  %v1800_v42 = vld [vmem:[%s2696_s6 + $0x60] sm:$0xff]  ;;  %v1265_v44 = vld [vmem:[%s2699_s9 + $0x38] sm:$0xff] }
  0xe8   :  { %1903 = vmatprep.subr.mxu1 %v2274_v9  ;;  %1909 = vmatpush3.msra.mxu0 %v1780_v20  ;;  %v1796_v43 = vld [vmem:[%s2723_s8 + $0x60] sm:$0xff]  ;;  %v1264_v45 = vld [vmem:[%s2699_s9 + $0x30] sm:$0xff]  ;;  %v1263_v46 = vld [vmem:[%s2699_s9 + $0x28] sm:$0xff] }
  0xe9   :  { %1904 = vmatpush3.msra.mxu1 %v590_v17  ;;  %1910 = vmatprep.subr.mxu0 %v2274_v9  ;;  %v1257_v47 = vld [vmem:[#allocation11 + $0x18] sm:$0xff]  ;;  %v1256_v48 = vld [vmem:[#allocation11 + $0x10] sm:$0xff]  ;;  %v1262_v49 = vld [vmem:[%s2699_s9 + $0x20] sm:$0xff] }
  0xea   :  { %1906 = vmatmul.mubr.msk.f32.vlgmr.msra.gmra.mxu1 %vm598_vm1, %v2481_v19  ;;  %1919 = vmatprep.subr.mxu1 %v2274_v9  ;;  %v1255_v50 = vld [vmem:[#allocation11 + $0x8] sm:$0xff]  ;;  %v1261_v51 = vld [vmem:[%s2699_s9 + $0x18] sm:$0xff]  ;;  %v1260_v53 = vld [vmem:[%s2699_s9 + $0x10] sm:$0xff] }
  0xeb   :  { %1920 = vmatpush3.msra.mxu1 %v1776_v21  ;;  %1911 = vmatpush3.msra.mxu0 %v1779_v22  ;;  %v1254_v52 = vld [vmem:[#allocation11] sm:$0xff]  ;;  %v1259_v54 = vld [vmem:[%s2699_s9 + $0x8] sm:$0xff]  ;;  %v1771_v59 = vld [vmem:[#allocation9] ss:$0 sm:$0xff] }
  0xec   :  { %1921 = vmatprep.subr.mxu1 %v2274_v9  ;;  %1912 = vmatprep.subr.mxu0 %v2274_v9  ;;  %v1258_v55 = vld [vmem:[%s2699_s9] sm:$0xff]  ;;  %v1783_v3 = vld [vmem:[#allocation9 + $0x1] ss:$0 sm:$0xff]  ;;  %v1795_v16 = vld [vmem:[#allocation9 + $0x2] ss:$0 sm:$0xff] }
  0xed   :  { %1922 = vmatpush3.msra.mxu1 %v1775_v23  ;;  %1913 = vmatpush3.msra.mxu0 %v1778_v24  ;;  %v2652_v56 = vld [vmem:[%s2725_s5] sm:$0xff]  ;;  %v1806_v23 = vld [vmem:[#allocation9 + $0x3] ss:$0 sm:$0xff] }
  0xee   :  { %1923 = vmatprep.subr.mxu1 %v2274_v9  ;;  %1914 = vmatprep.subr.mxu0 %v2274_v9 }
  0xef   :  { %1924 = vmatpush3.msra.mxu1 %v1774_v25  ;;  %1915 = vmatpush3.msra.mxu0 %v1777_v26 }
  0xf0   :  { %1925 = vmatprep.subr.mxu1 %v2274_v9  ;;  %1916 = vmatprep.mubr.msk.f32.mxu0 %vm2275_vm0, %v2274_v9 }
  0xf1   :  { %1926 = vmatpush3.msra.mxu1 %v1773_v27  ;;  %1927 = vmatprep.mubr.msk.f32.mxu1 %vm2275_vm0, %v2274_v9 }
  0xf2   :  { %1917 = vmatmul.mubr.msk.f32.vlgmr.msra.gmra.mxu0 %vm598_vm1, %v2479_v18  ;;  %1928 = vmatmul.mubr.msk.f32.vlgmr.msra.gmra.mxu1 %vm598_vm1, %v2481_v19 }
  0xf3   :  { %1930 = vmatprep.subr.mxu0 %v2274_v9  ;;  %1941 = vmatprep.subr.mxu1 %v2274_v9 }
  0xf4   :  { %1931 = vmatpush3.msra.mxu0 %v1792_v28  ;;  %1942 = vmatpush3.msra.mxu1 %v1788_v29 }
  0xf5   :  { %1932 = vmatprep.subr.mxu0 %v2274_v9  ;;  %1943 = vmatprep.subr.mxu1 %v2274_v9 }
  0xf6   :  { %1933 = vmatpush3.msra.mxu0 %v1791_v30  ;;  %1944 = vmatpush3.msra.mxu1 %v1787_v31 }
  0xf7   :  { %1934 = vmatprep.subr.mxu0 %v2274_v9  ;;  %1945 = vmatprep.subr.mxu1 %v2274_v9 }
  0xf8   :  { %1935 = vmatpush3.msra.mxu0 %v1790_v32  ;;  %1946 = vmatpush3.msra.mxu1 %v1786_v33  ;;  %v588_v32 = vld [vmem:[%s2726_s12] sm:$0xff] }
  0xf9   :  { %1936 = vmatprep.subr.mxu0 %v2274_v9  ;;  %1947 = vmatprep.subr.mxu1 %v2274_v9 }
  0xfa   :  { %1937 = vmatpush3.msra.mxu0 %v1789_v34  ;;  %1948 = vmatpush3.msra.mxu1 %v1785_v35 }
  0xfb   :  { %1938 = vmatprep.mubr.msk.f32.mxu0 %vm2275_vm0, %v2274_v9  ;;  %1949 = vmatprep.mubr.msk.f32.mxu1 %vm2275_vm0, %v2274_v9 }
  0xfc   :  { %1952 = vmatprep.subr.mxu0 %v2274_v9  ;;  %1963 = vmatprep.subr.mxu1 %v2274_v9 }
  0xfd   :  { %1939 = vmatmul.mubr.msk.f32.vlgmr.msra.gmra.mxu0 %vm598_vm1, %v2479_v18  ;;  %1950 = vmatmul.mubr.msk.f32.vlgmr.msra.gmra.mxu1 %vm598_vm1, %v2481_v19 }
  0xfe   :  { %1953 = vmatpush3.msra.mxu0 %v1803_v36  ;;  %1964 = vmatpush3.msra.mxu1 %v1799_v37 }
  0xff   :  { %1954 = vmatprep.subr.mxu0 %v2274_v9  ;;  %1965 = vmatprep.subr.mxu1 %v2274_v9 }
 0x100   :  { %1955 = vmatpush3.msra.mxu0 %v1802_v38  ;;  %1966 = vmatpush3.msra.mxu1 %v1798_v39 }
 0x101   :  { %1956 = vmatprep.subr.mxu0 %v2274_v9  ;;  %1967 = vmatprep.subr.mxu1 %v2274_v9 }
 0x102   :  { %1957 = vmatpush3.msra.mxu0 %v1801_v40  ;;  %1968 = vmatpush3.msra.mxu1 %v1797_v41  ;;  %v1812_v41 = vld [vmem:[#allocation17] ss:$0 sm:$0xff] }
 0x103   :  { %1958 = vmatprep.subr.mxu0 %v2274_v9  ;;  %1969 = vmatprep.subr.mxu1 %v2274_v9 }
 0x104   :  { %1959 = vmatpush3.msra.mxu0 %v1800_v42  ;;  %1960 = vmatprep.mubr.msk.f32.mxu0 %vm2275_vm0, %v2274_v9 }
 0x105   :  { %1970 = vmatpush3.msra.mxu1 %v1796_v43  ;;  %1971 = vmatprep.mubr.msk.f32.mxu1 %vm2275_vm0, %v2274_v9  ;;  %v1813_v43 = vld [vmem:[#allocation19] ss:$0 sm:$0xff] }
 0x106   :  { %1961 = vmatmul.mubr.msk.f32.vlgmr.msra.gmra.mxu0 %vm598_vm1, %v2479_v18  ;;  %1972 = vmatmul.mubr.msk.f32.vlgmr.msra.gmra.mxu1 %vm598_vm1, %v2481_v19 }
 0x107   :  { %1974 = vmatprep.subr.mxu0 %v2274_v9  ;;  %1993 = vmatprep.subr.mxu1 %v2274_v9 }
 0x108   :  { %1990 = vmatprep.mubr.msk.f32.mxu0 %vm2275_vm0, %v2274_v9  ;;  %2001 = vmatprep.mubr.msk.f32.mxu1 %vm2275_vm0, %v2274_v9 }
 0x109   :  { %1975 = vmatpush3.msra.mxu0 %v1265_v44  ;;  %1994 = vmatpush3.msra.mxu1 %v1257_v47 }
 0x10a   :  { %1976 = vmatprep.subr.mxu0 %v2274_v9  ;;  %1995 = vmatprep.subr.mxu1 %v2274_v9 }
 0x10b   :  { %1977 = vmatpush3.msra.mxu0 %v1264_v45  ;;  %1996 = vmatpush3.msra.mxu1 %v1256_v48 }
 0x10c   :  { %1978 = vmatprep.subr.mxu0 %v2274_v9  ;;  %1997 = vmatprep.subr.mxu1 %v2274_v9 }
 0x10d   :  { %1979 = vmatpush3.msra.mxu0 %v1263_v46  ;;  %1998 = vmatpush3.msra.mxu1 %v1255_v50  ;;  %v2033_v50 = vld [vmem:[#allocation14 + $0x8] sm:$0xff]  }
 0x10e   :  { %1980 = vmatprep.subr.mxu0 %v2274_v9  ;;  %1999 = vmatprep.subr.mxu1 %v2274_v9 }
 0x10f   :  { %1981 = vmatpush3.msra.mxu0 %v1262_v49  ;;  %2000 = vmatpush3.msra.mxu1 %v1254_v52 }
 0x110   :  { %1982 = vmatprep.subr.mxu0 %v2274_v9  ;;  %2004 = vmatprep.subr.bf16.mxu1 %v2274_v9 }
 0x111   :  { %1983 = vmatpush3.msra.mxu0 %v1261_v51  ;;  %v2034_v51 = vld [vmem:[#allocation14] sm:$0xff]  }
 0x112   :  { %1984 = vmatprep.subr.mxu0 %v2274_v9 }
 0x113   :  { %1985 = vmatpush3.msra.mxu0 %v1260_v53  ;;  %v1810_v53 = vld [vmem:[#allocation13] ss:$0 sm:$0xff] }
 0x114   :  { %1986 = vmatprep.subr.mxu0 %v2274_v9 }
 0x115   :  { %1987 = vmatpush3.msra.mxu0 %v1259_v54 }
 0x116   :  { %1988 = vmatprep.subr.mxu0 %v2274_v9 }
 0x117   :  { %1989 = vmatpush3.msra.mxu0 %v1258_v55 }
 0x118   :  { %1991 = vmatmul.mubr.msk.f32.vlgmr.msra.gmra.mxu0 %vm1266_vm2, %v2652_v56 }
 0x1a6   :  { %v668_v57 = vpop.f32.mrf.mxu0 }
 0x1a8   :  { %v1896_v61 = vpop.f32.mrf.mxu0 }
 0x1a9   :  { %v1817_v61 = vld [vmem:[#allocation16] ss:$0 sm:$0xff] }
 0x1aa   :  { %v741_v58 = vpop.f32.mrf.mxu1 }
 0x1ab   :  { %v742_v60 = vadd.f32 %v741_v58, %v668_v57 }
 0x1ac   :  { %v1907_v62 = vpop.f32.mrf.mxu1 }
 0x1ad   :  { %v752_v63 = vadd.f32 %v1771_v59, %v742_v60  ;;  %v2276_v60 = vmov -inf  }
 0x1ae   :  { %1494 = vst.msk [vmem:[#allocation4] sm:$0xff] %vm1493_vm4, %v2276_v60 }
 0x1af   :  { %v1772_v0 = vmul.f32 -1.442695, %v752_v63 }
 0x1b1   :  { %2035 = vpow2.f32 %v1772_v0 }
 0x1b2   :  { %v835_v1 = vpop.f32.mrf.mxu0  ;;  %v905_v2 = vpop.f32.mrf.mxu1 }
 0x1b3   :  { %v906_v4 = vadd.f32 %v905_v2, %v835_v1  ;;  %v1814_v1 = vld [vmem:[#allocation20] ss:$0 sm:$0xff] }
 0x1b4   :  { %v1918_v5 = vpop.f32.mrf.mxu0  ;;  %v1929_v6 = vpop.f32.mrf.mxu1 }
 0x1b5   :  { %v917_v7 = vadd.f32 %v1783_v3, %v906_v4  ;;  %v1468_v5 = vmul.f32 %v1814_v1, %v2481_v19 }
 0x1b7   :  { %v1784_v8 = vmul.f32 -1.442695, %v917_v7  ;;  %v1469_v7 = vsel %vm598_vm1, %v1468_v5, 0.0 }
 0x1b9   :  { %2037 = vpow2.f32 %v1784_v8  ;;  %v2277_v8 = vmov 0  }
 0x1ba   :  { %2031 = vset.pattern.permute.xlu1 %v2277_v8  ;;  %2032 = vset.pattern.permute.xlu0 %v2277_v8 }
 0x1bd   :  { %v1000_v10 = vpop.f32.mrf.mxu0  ;;  %v1070_v11 = vpop.f32.mrf.mxu1 }
 0x1be   :  { %v2036_v12 = vpop.eup %2035  ;;  %v1071_v13 = vadd.f32 %v1070_v11, %v1000_v10  ;;  %v1566_v10 = vld [vmem:[#allocation4] sm:$0xff] }
 0x1bf   :  { %v1940_v14 = vpop.f32.mrf.mxu0  ;;  %v1951_v15 = vpop.f32.mrf.mxu1  ;;  %v756_v17 = vadd.f32 1.0, %v2036_v12 }
 0x1c0   :  { %v1082_v18 = vadd.f32 %v1795_v16, %v1071_v13 }
 0x1c1   :  { %2039 = vrcp.f32 %v756_v17 }
 0x1c2   :  { %2041 = vtanh.f32 %v1082_v18 }
 0x1c6   :  { %v2038_v20 = vpop.eup %2037  ;;  %v1160_v21 = vpop.f32.mrf.mxu0 }
 0x1c7   :  { %v1230_v22 = vpop.f32.mrf.mxu1  ;;  %v921_v24 = vadd.f32 1.0, %v2038_v20  ;;  %v1815_v20 = vld [vmem:[#allocation8] ss:$0 sm:$0xff] }
 0x1c8   :  { %v1231_v25 = vadd.f32 %v1230_v22, %v1160_v21  ;;  %v1962_v26 = vpop.f32.mrf.mxu0 }
 0x1c9   :  { %v1973_v27 = vpop.f32.mrf.mxu1  ;;  %2043 = vrcp.f32 %v921_v24 }
 0x1ca   :  { %v1242_v28 = vadd.f32 %v1806_v23, %v1231_v25 }
 0x1cc   :  { %v1807_v29 = vmul.f32 -1.442695, %v1242_v28 }
 0x1ce   :  { %2045 = vpow2.f32 %v1807_v29  ;;  %v2040_v30 = vpop.eup %2039 }
 0x1cf   :  { %v2042_v31 = vpop.eup %2041 }
 0x1d0   :  { %v1250_v35 = vmul.f32 %v2042_v31, %v2040_v30 }
 0x1d6   :  { %v2044_v33 = vpop.eup %2043 }
 0x1d7   :  { %v1249_v34 = vmul.f32 %v2044_v33, %v588_v32 }
 0x1d8   :  { %v1336_v48 = vpop.f32.mrf.mxu0 }
 0x1d9   :  { %v1251_v36 = vadd.f32 %v1250_v35, %v1249_v34 }
 0x1da   :  { %v1992_v49 = vpop.f32.mrf.mxu0 }
 0x1db   :  { %v2046_v37 = vpop.eup %2045  ;;  %2047 = vtanh.f32 %v1251_v36  ;;  %1425 = vst.msk [vmem:[%s2709_s20] sm:$0xff] %vm598_vm1, %v1251_v36  ;;  %v1456_v46 = vmul.f32 %v1813_v43, %v1251_v36 }
 0x1dc   :  { %v1246_v38 = vadd.f32 1.0, %v2046_v37 }
 0x1dd   :  { %v1457_v47 = vsel %vm598_vm1, %v1456_v46, 0.0 }
 0x1de   :  { %2049 = vrcp.f32 %v1246_v38 }
 0x1e8   :  { %v2048_v39 = vpop.eup %2047 }
 0x1eb   :  { %v2050_v40 = vpop.eup %2049 }
 0x1ec   :  { %v1253_v42 = vmul.f32 %v2050_v40, %v2048_v39 }
 0x1ee   :  { %2002 = vmatmul.mubr.msk.f32.vlgmr.msra.gmra.mxu1 %vm598_vm1, %v1253_v42  ;;  %1424 = vst.msk [vmem:[%s2708_s19] sm:$0xff] %vm598_vm1, %v1253_v42  ;;  %v1444_v44 = vmul.f32 %v1812_v41, %v1253_v42 }
 0x1ef   :  { %2008 = vmatprep.mubr.msk.bf16.mxu1 %vm2275_vm0, %v2274_v9  ;;  %2005 = vmatpush3.bf16.msra.mxu1 %v2033_v50 }
 0x1f0   :  { %v1445_v45 = vsel %vm598_vm1, %v1444_v44, 0.0  ;;  %2006 = vmatprep.subr.bf16.mxu1 %v2274_v9  ;;  %v1811_v9 = vld [vmem:[%s2727_s2] ss:$0 sm:$0xff] }
 0x1f1   :  { %1446 = vadd.xlane.f32.xlu1 %v1445_v45  ;;  %v1433_v63 = vmul.f32 %v1811_v9, %v2652_v56 }
 0x1f3   :  { %2007 = vmatpush3.bf16.msra.mxu1 %v2034_v51  ;;  %v1434_v4 = vsel %vm1266_vm2, %v1433_v63, 0.0 }
 0x1f5   :  { %1458 = vadd.xlane.f32.xlu1 %v1457_v47 }
 0x27a   :  { %v1447_v13 = vpop.xlane.xlu1 %1446 }
 0x27e   :  { %v1459_v16 = vpop.xlane.xlu1 %1458 }
 0x2ae   :  { %v1409_v52 = vpop.f32.mrf.mxu1 }
 0x2af   :  { %v1410_v54 = vadd.f32 %v1409_v52, %v1336_v48 }
 0x2b0   :  { %v2003_v55 = vpop.f32.mrf.mxu1 }
 0x2b1   :  { %v1420_v57 = vadd.f32 %v1810_v53, %v1410_v54 }
 0x2b3   :  { %v1421_v58 = vpack.c.bf16 %v1420_v57, %v1420_v57 }
 0x2b5   :  { %1423 = vst.msk [vmem:[#allocation3] sm:$0xf] %vm1422_vm3, %v1421_v58 }
 0x2bc   :  { %v1495_v59 = vld [vmem:[#allocation3] sm:$0xf] }
 0x2bd   :  { %2009 = vmatmul.mubr.msk.bf16.vlgmr.msra.gmra.mxu1 %vm598_vm1, %v1495_v59 }
 0x37d   :  { %v1557_v62 = vpop.f32.mrf.mxu1 }
 0x37e   :  { %v1558_v0 = vadd.f32 %v1817_v61, %v1557_v62 }
 0x37f   :  { %v2010_v2 = vpop.f32.mrf.mxu1 }
 0x380   :  { %1567 = vmax.xlane.f32.xlu0 %v1558_v0 }
 0x381   :  { %v1560_v3 = vpop.f32.mrf.mxu1 }
 0x383   :  { %v2011_v6 = vpop.f32.mrf.mxu1 }
 0x384   :  { %1435 = vadd.xlane.f32.xlu0 %v1434_v4 }
 0x388   :  { %1470 = vadd.xlane.f32.xlu0 %v1469_v7 }
 0x409   :  { %v1568_v11 = vpop.xlane.xlu0 %1567 }
 0x40a   :  { %v1569_v56 = vmax.f32 %v1566_v10, %v1568_v11 }
 0x40c   :  { %1571 = vst.msk [vmem:[#allocation4] sm:$0xff] %vm1493_vm4, %v1569_v56 }
 0x40d   :  { %v1436_v14 = vpop.xlane.xlu0 %1435 }
 0x40e   :  { %v1448_v15 = vadd.f32 %v1447_v13, %v1436_v14 }
 0x410   :  { %v1460_v19 = vadd.f32 %v1459_v16, %v1448_v15 }
 0x411   :  { %v1471_v17 = vpop.xlane.xlu0 %1470 }
 0x412   :  { %v1472_v18 = vadd.f32 %v1471_v17, %v1460_v19 }
 0x413   :  { %v1576_v12 = vld [vmem:[#allocation4] sm:$0xff] }
 0x414   :  { %1579 = vperm.xlu1 %2031, %v1576_v12   ;;  %v1480_v21 = vadd.f32 %v1815_v20, %v1472_v18 }
 0x416   :  { %v1816_v24 = vmul.f32 -1.442695, %v1480_v21 }
 0x48f   :  { %v1580_v22 = vpop.permute.xlu1 %1579 }
 0x490   :  { %v1582_v23 = vsub.f32 %v1558_v0, %v1580_v22 }
 0x492   :  { %v1583_v25 = vmul.f32 1.442695, %v1582_v23 }
 0x494   :  { %2051 = vpow2.f32 %v1583_v25 }
 0x495   :  { %2053 = vpow2.f32 %v1816_v24 }
 0x4a1   :  { %v2052_v26 = vpop.eup %2051 }
 0x4a2   :  { %1585 = vadd.xlane.f32.xlu0 %v2052_v26  ;;  %v2054_v27 = vpop.eup %2053 }
 0x4a3   :  { %v1484_v28 = vadd.f32 1.0, %v2054_v27 }
 0x4a5   :  { %2055 = vrcp.f32 %v1484_v28 }
 0x4b2   :  { %v2056_v29 = vpop.eup %2055 }
 0x4b8   :  { %1489 = vperm.xlu0 %2032, %v2056_v29  }
 0x52b   :  { %v1586_v30 = vpop.xlane.xlu0 %1585 }
 0x52c   :  { %2057 = vrcp.f32 %v1586_v30 }
 0x533   :  { %v1490_v31 = vpop.permute.xlu0 %1489 }
 0x534   :  { %1492 = vst [vmem:[%s2710_s21] sm:$0xff] %v1490_v31 }
 0x539   :  { %v2058_v32 = vpop.eup %2057 }
 0x53a   :  { %v1589_v33 = vmul.f32 %v2058_v32, %v2052_v26 }
 0x53c   :  { %1590 = vst [vmem:[%s2707_s18] sm:$0xff] %v1589_v33 }
 0x53d   :  { %1607 = vsyncpa [#allocation10], 1 }
 0x53e   :  { %1608 = vsyncpa [#allocation12], 1 }
 0x53f   :  { %1609 = vsyncpa [#allocation15], 1 }
 0x540   :  { %1610 = vsyncpa [#allocation18], 1 }
 0x541   :  { %1611 = vsyncpa [#allocation21], 1 }
 0x542   :  { %1612 = vsyncmov [#allocation5] }
 0x545   :  { %s1613_s16 = vpop.sfrf %1612 }
 0x546   :  { %p1821_p3 = scmp.ne.s32.totalorder %s1613_s16, 0 }
 0x548   :  { %1617 = shalt.err (%p1821_p3)  }
 0x549   :  { %1619 = vsyncmov [#allocation5 + $0x1] }
 0x54c   :  { %s1620_s27 = vpop.sfrf %1619 }
 0x54d   :  { %p1822_p4 = scmp.ne.s32.totalorder %s1620_s27, 0 }
 0x54f   :  { %1624 = shalt.err (%p1822_p4)  }
 0x550   :  { %1626 = vsyncmov [#allocation5 + $0x2] }
 0x553   :  { %s1627_s21 = vpop.sfrf %1626 }
 0x554   :  { %p1823_p5 = scmp.ne.s32.totalorder %s1627_s21, 0 }
 0x556   :  { %1631 = shalt.err (%p1823_p5)  }
 0x557   :  { %1633 = vsyncmov [#allocation5 + $0x3] }
 0x55a   :  { %s1634_s3 = vpop.sfrf %1633 }
 0x55b   :  { %p1824_p6 = scmp.ne.s32.totalorder %s1634_s3, 0 }
 0x55d   :  { %1638 = shalt.err (%p1824_p6)  }
 0x55e   :  { %1640 = vsyncmov [#allocation5 + $0x4] }
 0x561   :  { %s1641_s18 = vpop.sfrf %1640 }
 0x562   :  { %p1825_p7 = scmp.ne.s32.totalorder %s1641_s18, 0 }
 0x564   :  { %1645 = shalt.err (%p1825_p7)  }
 0x565   :  { %1647 = vsyncmov [#allocation5 + $0x5] }
 0x568   :  { %s1648_s25 = vpop.sfrf %1647 }
 0x569   :  { %p1826_p8 = scmp.ne.s32.totalorder %s1648_s25, 0 }
 0x56b   :  { %1652 = shalt.err (%p1826_p8)  }
 0x56c   :  { %1654 = vsyncmov [#allocation5 + $0x6] }
 0x56f   :  { %s1655_s28 = vpop.sfrf %1654 }
 0x570   :  { %p1827_p9 = scmp.ne.s32.totalorder %s1655_s28, 0 }
 0x572   :  { %1659 = shalt.err (%p1827_p9)  }
 0x573   :  { %1661 = vsyncmov [#allocation5 + $0x7] }
 0x576   :  { %s1662_s7 = vpop.sfrf %1661 }
 0x577   :  { %p1828_p10 = scmp.ne.s32.totalorder %s1662_s7, 0 }
 0x579   :  { %1666 = shalt.err (%p1828_p10)  }

</bundles_post_ra>
